<compile_context>
chip_gen: v6e
topology: v6e:2x2x1
jax: 0.10.0
libtpu: 0.0.40
codegen_flags: <defaults>
</compile_context>

<pallas_src>
import jax
import jax.numpy as jnp
from jax.experimental import pallas as pl
from jax.experimental.pallas import tpu as pltpu


def _round_up(x, m):
    return ((x + m - 1) // m) * m


def _cdiv(a, b):
    return -(-a // b)


def qnetwork_kernel(seq_ref, act_ref,
                    w1s_ref, w1a_ref, b1_ref,
                    w2_ref, b2_ref,
                    w3_ref, b3_ref,
                    q_ref):
    # seq_ref: [TB, S*D]  (state_encoder mean-pool already folded into w1s_ref)
    x = seq_ref[...].astype(w1s_ref.dtype)                       # bf16 for MXU
    a = act_ref[...].astype(w1a_ref.dtype)                       # [TB, A] bf16

    # --- fc layer 1: Linear(D + A, H) as split matmuls (== concat @ W1) ------
    h1 = (jnp.dot(x, w1s_ref[...], preferred_element_type=jnp.float32)
          + jnp.dot(a, w1a_ref[...], preferred_element_type=jnp.float32)
          + b1_ref[...])                                         # [TB, H] f32
    h1 = jnp.maximum(h1, 0.0).astype(w2_ref.dtype)

    # --- fc layer 2: Linear(H, H) -> ReLU -------------------------------------
    h2 = jnp.dot(h1, w2_ref[...], preferred_element_type=jnp.float32) + b2_ref[...]
    h2 = jnp.maximum(h2, 0.0)                                    # stay f32

    # --- fc layer 3: Linear(H, 1) on the VPU (no degenerate N=1 MXU matmul) ---
    # [TB,H] * [1,H] -> lane-sum -> [TB,1]
    q_ref[...] = jnp.sum(h2 * w3_ref[...], axis=-1, keepdims=True) + b3_ref[...]


def qnetwork_forward(state_seq, action, params, *,
                     param_dtype=jnp.bfloat16, block_b=1024, min_steps=2):
    """Q(state_seq, action) -> [B, 1]."""
    B, S, D = state_seq.shape
    A = action.shape[1]
    H = params["w1"].shape[1]
    assert params["w1"].shape[0] == D + A

    # Batch tiling: at least `min_steps` grid steps (dual-TC on v7x), tiles
    # sized to the batch (multiple of 8 sublanes) to avoid padding waste.
    n_steps = max(min_steps, _cdiv(B, block_b))
    TB = _round_up(_cdiv(B, n_steps), 8)
    B_pad = TB * n_steps

    # Flatten the sequence axis into the lane axis (free contiguous reshape).
    seq_flat = state_seq.reshape(B, S * D)
    if B_pad != B:
        seq_flat = jnp.pad(seq_flat, ((0, B_pad - B), (0, 0)))
        action = jnp.pad(action, ((0, B_pad - B), (0, 0)))

    # Fold the (linear) mean-pool encoder into W1:
    #   mean_s(x) @ W1s == x_flat @ (tile(W1s, (S,1)) / S)
    w1s = (jnp.tile(params["w1"][:D], (S, 1)) / S).astype(param_dtype)  # [S*D, H]
    w1a = params["w1"][D:].astype(param_dtype)                          # [A, H]
    w2 = params["w2"].astype(param_dtype)                               # [H, H]
    b1 = params["b1"].astype(jnp.float32)                               # [1, H]
    b2 = params["b2"].astype(jnp.float32)                               # [1, H]
    # Layer 3 kept in f32 (VPU path; DMA cost negligible, better precision).
    w3 = params["w3"].reshape(1, H).astype(jnp.float32)                 # [1, H]
    b3 = params["b3"].astype(jnp.float32)                               # [1, 1]

    grid = (n_steps,)

    # Constant index_map -> same weight block every step -> stays VMEM-resident.
    def const(shape):
        return pl.BlockSpec(shape, lambda i: (0, 0))

    q = pl.pallas_call(
        qnetwork_kernel,
        out_shape=jax.ShapeDtypeStruct((B_pad, 1), jnp.float32),
        grid=grid,
        in_specs=[
            pl.BlockSpec((TB, S * D), lambda i: (i, 0)),     # flattened state tile
            pl.BlockSpec((TB, A), lambda i: (i, 0)),         # action tile
            const((S * D, H)), const((A, H)), const((1, H)),  # layer 1
            const((H, H)), const((1, H)),                      # layer 2
            const((1, H)), const((1, 1)),                      # layer 3
        ],
        out_specs=pl.BlockSpec((TB, 1), lambda i: (i, 0)),
        compiler_params=pltpu.CompilerParams(
            dimension_semantics=("parallel",),               # dual-TC on v7x
        ),
    )(seq_flat, action, w1s, w1a, b1, w2, b2, w3, b3)

    return q[:B]


def init_params(key, d_model, action_dim, hidden_dim):
    """Deterministic init mimicking PyTorch nn.Linear default U(-1/sqrt(fan_in), +)."""
    ks = jax.random.split(key, 6)

    def linear(kw, kb, fan_in, fan_out):
        bound = 1.0 / jnp.sqrt(fan_in)
        w = jax.random.uniform(kw, (fan_in, fan_out), jnp.float32, -bound, bound)
        b = jax.random.uniform(kb, (1, fan_out), jnp.float32, -bound, bound)
        return w, b

    w1, b1 = linear(ks[0], ks[1], d_model + action_dim, hidden_dim)
    w2, b2 = linear(ks[2], ks[3], hidden_dim, hidden_dim)
    w3, b3 = linear(ks[4], ks[5], hidden_dim, 1)
    return dict(w1=w1, b1=b1, w2=w2, b2=b2, w3=w3, b3=b3)


def qnetwork_ref(state_seq, action, p):
    """Pure-JAX f32 reference for correctness checking."""
    enc = jnp.mean(state_seq, axis=1)
    x = jnp.concatenate([enc, action], axis=-1)
    h1 = jnp.maximum(x @ p["w1"] + p["b1"], 0.0)
    h2 = jnp.maximum(h1 @ p["w2"] + p["b2"], 0.0)
    return h2 @ p["w3"] + p["b3"]


if __name__ == "__main__":
    # B=300 -> n_steps=2, TB=152, B_pad=304 (grid-exercising, <3% padding).
    B, S, D = 300, 8, 32        # batch, sequence length, d_model
    A, H = 4, 256               # action_dim, hidden_dim (module default)

    key = jax.random.PRNGKey(0)
    k_s, k_a, k_p = jax.random.split(key, 3)
    state_seq = jax.random.normal(k_s, (B, S, D), jnp.float32)
    action = jax.random.normal(k_a, (B, A), jnp.float32)
    params = init_params(k_p, D, A, H)

    q = qnetwork_forward(state_seq, action, params)
    jax.block_until_ready(q)

    q_ref = qnetwork_ref(state_seq, action, params)
    assert q.shape == (B, 1), q.shape
    max_err = float(jnp.max(jnp.abs(q - q_ref)))
    # bf16 weights/activations (f32 accumulation, f32 final layer) vs f32 ref.
    assert jnp.allclose(q, q_ref, atol=2e-2, rtol=2e-2), f"max|diff|={max_err}"

    print("KERNEL_OK")
</pallas_src>

<mosaic_0001>
module attributes {stable_mosaic.version = 11 : i64} {
  func.func @qnetwork_kernel(%arg0: i32, %arg1: memref<152x256xf32, #tpu.memory_space<vmem>>, %arg2: memref<152x4xf32, #tpu.memory_space<vmem>>, %arg3: memref<256x256xbf16, #tpu.memory_space<vmem>>, %arg4: memref<4x256xbf16, #tpu.memory_space<vmem>>, %arg5: memref<1x256xf32, #tpu.memory_space<vmem>>, %arg6: memref<256x256xbf16, #tpu.memory_space<vmem>>, %arg7: memref<1x256xf32, #tpu.memory_space<vmem>>, %arg8: memref<1x256xf32, #tpu.memory_space<vmem>>, %arg9: memref<1x1xf32, #tpu.memory_space<vmem>>, %arg10: memref<152x1xf32, #tpu.memory_space<vmem>>) attributes {dimension_semantics = [#tpu.dimension_semantics<parallel>], iteration_bounds = array<i64: 2>, scalar_prefetch = 0 : i64, scratch_operands = 0 : i64, tpu.core_type = #tpu.core_type<tc>, window_params = [{transform_indices = @transform_0, window_bounds = array<i64: 152, 256>}, {transform_indices = @transform_1, window_bounds = array<i64: 152, 4>}, {pipeline_mode = #tpu.pipeline_mode<synchronous>, transform_indices = @transform_2, window_bounds = array<i64: 256, 256>}, {pipeline_mode = #tpu.pipeline_mode<synchronous>, transform_indices = @transform_3, window_bounds = array<i64: 4, 256>}, {pipeline_mode = #tpu.pipeline_mode<synchronous>, transform_indices = @transform_4, window_bounds = array<i64: 1, 256>}, {pipeline_mode = #tpu.pipeline_mode<synchronous>, transform_indices = @transform_5, window_bounds = array<i64: 256, 256>}, {pipeline_mode = #tpu.pipeline_mode<synchronous>, transform_indices = @transform_6, window_bounds = array<i64: 1, 256>}, {pipeline_mode = #tpu.pipeline_mode<synchronous>, transform_indices = @transform_7, window_bounds = array<i64: 1, 256>}, {pipeline_mode = #tpu.pipeline_mode<synchronous>, transform_indices = @transform_8, window_bounds = array<i64: 1, 1>}, {transform_indices = @transform_9, window_bounds = array<i64: 152, 1>}]} {
    %c0 = arith.constant 0 : index
    %c0_0 = arith.constant 0 : index
    %0 = vector.load %arg1[%c0, %c0_0] : memref<152x256xf32, #tpu.memory_space<vmem>>, vector<152x256xf32>
    %1 = arith.truncf %0 : vector<152x256xf32> to vector<152x256xbf16>
    %c0_1 = arith.constant 0 : index
    %c0_2 = arith.constant 0 : index
    %2 = vector.load %arg2[%c0_1, %c0_2] : memref<152x4xf32, #tpu.memory_space<vmem>>, vector<152x4xf32>
    %3 = arith.truncf %2 : vector<152x4xf32> to vector<152x4xbf16>
    %c0_3 = arith.constant 0 : index
    %c0_4 = arith.constant 0 : index
    %4 = vector.load %arg3[%c0_3, %c0_4] : memref<256x256xbf16, #tpu.memory_space<vmem>>, vector<256x256xbf16>
    %cst = arith.constant dense<0.000000e+00> : vector<152x256xf32>
    %5 = tpu.matmul %1, %4, %cst {dimension_numbers = #tpu.dot_dimension_numbers<[1], [0], [0], [1], [0, 0, 1, 1], [], []>} : vector<152x256xbf16>, vector<256x256xbf16>, vector<152x256xf32> -> vector<152x256xf32>
    %c0_5 = arith.constant 0 : index
    %c0_6 = arith.constant 0 : index
    %6 = vector.load %arg4[%c0_5, %c0_6] : memref<4x256xbf16, #tpu.memory_space<vmem>>, vector<4x256xbf16>
    %cst_7 = arith.constant dense<0.000000e+00> : vector<152x256xf32>
    %7 = tpu.matmul %3, %6, %cst_7 {dimension_numbers = #tpu.dot_dimension_numbers<[1], [0], [0], [1], [0, 0, 1, 1], [], []>} : vector<152x4xbf16>, vector<4x256xbf16>, vector<152x256xf32> -> vector<152x256xf32>
    %8 = arith.addf %5, %7 : vector<152x256xf32>
    %c0_8 = arith.constant 0 : index
    %c0_9 = arith.constant 0 : index
    %9 = vector.load %arg5[%c0_8, %c0_9] : memref<1x256xf32, #tpu.memory_space<vmem>>, vector<1x256xf32>
    %10 = vector.broadcast %9 : vector<1x256xf32> to vector<152x256xf32>
    %11 = arith.addf %8, %10 : vector<152x256xf32>
    %cst_10 = arith.constant 0.000000e+00 : f32
    %12 = vector.broadcast %cst_10 : f32 to vector<152x256xf32>
    %13 = arith.maximumf %11, %12 : vector<152x256xf32>
    %14 = arith.truncf %13 : vector<152x256xf32> to vector<152x256xbf16>
    %c0_11 = arith.constant 0 : index
    %c0_12 = arith.constant 0 : index
    %15 = vector.load %arg6[%c0_11, %c0_12] : memref<256x256xbf16, #tpu.memory_space<vmem>>, vector<256x256xbf16>
    %cst_13 = arith.constant dense<0.000000e+00> : vector<152x256xf32>
    %16 = tpu.matmul %14, %15, %cst_13 {dimension_numbers = #tpu.dot_dimension_numbers<[1], [0], [0], [1], [0, 0, 1, 1], [], []>} : vector<152x256xbf16>, vector<256x256xbf16>, vector<152x256xf32> -> vector<152x256xf32>
    %c0_14 = arith.constant 0 : index
    %c0_15 = arith.constant 0 : index
    %17 = vector.load %arg7[%c0_14, %c0_15] : memref<1x256xf32, #tpu.memory_space<vmem>>, vector<1x256xf32>
    %18 = vector.broadcast %17 : vector<1x256xf32> to vector<152x256xf32>
    %19 = arith.addf %16, %18 : vector<152x256xf32>
    %cst_16 = arith.constant 0.000000e+00 : f32
    %20 = vector.broadcast %cst_16 : f32 to vector<152x256xf32>
    %21 = arith.maximumf %19, %20 : vector<152x256xf32>
    %c0_17 = arith.constant 0 : index
    %c0_18 = arith.constant 0 : index
    %22 = vector.load %arg8[%c0_17, %c0_18] : memref<1x256xf32, #tpu.memory_space<vmem>>, vector<1x256xf32>
    %23 = vector.broadcast %22 : vector<1x256xf32> to vector<152x256xf32>
    %24 = arith.mulf %21, %23 : vector<152x256xf32>
    %cst_19 = arith.constant dense<0.000000e+00> : vector<152xf32>
    %25 = vector.multi_reduction <add>, %24, %cst_19 [1] : vector<152x256xf32> to vector<152xf32>
    %26 = vector.shape_cast %25 : vector<152xf32> to vector<152x1xf32>
    %c0_20 = arith.constant 0 : index
    %c0_21 = arith.constant 0 : index
    %27 = vector.load %arg9[%c0_20, %c0_21] : memref<1x1xf32, #tpu.memory_space<vmem>>, vector<1x1xf32>
    %28 = vector.broadcast %27 : vector<1x1xf32> to vector<152x1xf32>
    %29 = arith.addf %26, %28 : vector<152x1xf32>
    %c0_22 = arith.constant 0 : index
    %c0_23 = arith.constant 0 : index
    %30 = vector.load %arg10[%c0_22, %c0_23] : memref<152x1xf32, #tpu.memory_space<vmem>>, vector<152x1xf32>
    tpu.vector_store %arg10[%c0_22, %c0_23], %29 {strides = array<i32>} : memref<152x1xf32, #tpu.memory_space<vmem>>, vector<152x1xf32>,
    return
  }
  func.func @transform_0(%arg0: i32) -> (i32, i32) {
    %c0_i32 = arith.constant 0 : i32
    %c0_i32_0 = arith.constant 0 : i32
    return %arg0, %c0_i32 : i32, i32
  }
  func.func @transform_1(%arg0: i32) -> (i32, i32) {
    %c0_i32 = arith.constant 0 : i32
    %c0_i32_0 = arith.constant 0 : i32
    return %arg0, %c0_i32 : i32, i32
  }
  func.func @transform_2(%arg0: i32) -> (i32, i32) {
    %c0_i32 = arith.constant 0 : i32
    %c0_i32_0 = arith.constant 0 : i32
    %c0_i32_1 = arith.constant 0 : i32
    return %c0_i32, %c0_i32_0 : i32, i32
  }
  func.func @transform_3(%arg0: i32) -> (i32, i32) {
    %c0_i32 = arith.constant 0 : i32
    %c0_i32_0 = arith.constant 0 : i32
    %c0_i32_1 = arith.constant 0 : i32
    return %c0_i32, %c0_i32_0 : i32, i32
  }
  func.func @transform_4(%arg0: i32) -> (i32, i32) {
    %c0_i32 = arith.constant 0 : i32
    %c0_i32_0 = arith.constant 0 : i32
    %c0_i32_1 = arith.constant 0 : i32
    return %c0_i32, %c0_i32_0 : i32, i32
  }
  func.func @transform_5(%arg0: i32) -> (i32, i32) {
    %c0_i32 = arith.constant 0 : i32
    %c0_i32_0 = arith.constant 0 : i32
    %c0_i32_1 = arith.constant 0 : i32
    return %c0_i32, %c0_i32_0 : i32, i32
  }
  func.func @transform_6(%arg0: i32) -> (i32, i32) {
    %c0_i32 = arith.constant 0 : i32
    %c0_i32_0 = arith.constant 0 : i32
    %c0_i32_1 = arith.constant 0 : i32
    return %c0_i32, %c0_i32_0 : i32, i32
  }
  func.func @transform_7(%arg0: i32) -> (i32, i32) {
    %c0_i32 = arith.constant 0 : i32
    %c0_i32_0 = arith.constant 0 : i32
    %c0_i32_1 = arith.constant 0 : i32
    return %c0_i32, %c0_i32_0 : i32, i32
  }
  func.func @transform_8(%arg0: i32) -> (i32, i32) {
    %c0_i32 = arith.constant 0 : i32
    %c0_i32_0 = arith.constant 0 : i32
    %c0_i32_1 = arith.constant 0 : i32
    return %c0_i32, %c0_i32_0 : i32, i32
  }
  func.func @transform_9(%arg0: i32) -> (i32, i32) {
    %c0_i32 = arith.constant 0 : i32
    %c0_i32_0 = arith.constant 0 : i32
    return %arg0, %c0_i32 : i32, i32
  }
}

</mosaic_0001>

<bundles_post_ra>
// kernel: tpu_custom_call.1
= control target key start
LH: loop header
LB: loop body
LE: loop exit
PB: predicated region body
PF: predicated region fallthrough
CT: control target
= control target key end

     0   :  { %s2662_s0 = inlined_call_operand.hbm [shape: f32[304,256], index: 0, kind: input, shape index: {}]   ;;  %s2663_s1 = inlined_call_operand.vmem [shape: f32[304,4], index: 1, kind: input, shape index: {}]   ;;  %s2664_s2 = inlined_call_operand.vmem [shape: bf16[256,256], index: 2, kind: input, shape index: {}]   ;;  %s2665_s3 = inlined_call_operand.vmem [shape: bf16[4,256], index: 3, kind: input, shape index: {}]   ;;  %s2666_s4 = inlined_call_operand.vmem [shape: f32[1,256], index: 4, kind: input, shape index: {}]   ;;  %s2667_s5 = inlined_call_operand.hbm [shape: bf16[256,256], index: 5, kind: input, shape index: {}]   ;;  %s2668_s6 = inlined_call_operand.vmem [shape: f32[1,256], index: 6, kind: input, shape index: {}]   ;;  %s2669_s7 = inlined_call_operand.vmem [shape: f32[1,256], index: 7, kind: input, shape index: {}]   ;;  %s2670_s8 = inlined_call_operand.<no memory space> [shape: f32[1,1], index: 8, kind: input, shape index: {}]   ;;  %s2671_s9 = inlined_call_operand.vmem [shape: f32[304,1], index: 9, kind: output, shape index: {}]  }
   0x1   :  { %v14_v0 = vstv %s2670_s8 }
   0x2   :  { %15 = vst [vmem:[#allocation2] sm:$0x1] %v14_v0 }
   0x3   :  { %16 = vsyncpa [#allocation4], 0 }
   0x4   :  { %18 = vsyncpa [#allocation4 + $0x1], 0 }
   0x5   :  { %19 = vsyncpa [#allocation6], 0  ;;  %s2110_s11 = smov 0   ;;  %s2112_s12 = smov 0  }
   0x6   :  { %s2114_s13 = smov 0   ;;  %s2116_s14 = smov 0  }
   0x7 LB: > { %s1708_s8 = sadd.s32 4294967295, %s2048_s14   ;;  %p45_p0 = scmp.ne.s32.totalorder %s2040_s12, %s2036_s11  ;;  %s2048_s14 = sphi %s2116_s14, %s2687_s14   ;;  %s2044_s13 = sphi %s2114_s13, %s2686_s13   ;;  %s2040_s12 = sphi %s2112_s12, %s2685_s12   ;;  %s2036_s11 = sphi %s2110_s11, %s2684_s11  }
   0x8   : > { %p2132_p1 = scmp.eq.s32.totalorder %s1708_s8, 0  ;;  %p1710_p2 = scmp.ge.s32.totalorder %s2048_s14, 1 }
   0x9   : > { %p255_p3 = scmp.lt.s32.totalorder %s2048_s14, 3  ;;  %s2050_s18 = smov [#allocation5]  }
   0xa   : > { %s2676_s15 = scalar_select %p2132_p1, 1, 0 }
   0xb   : > { %p2140_p4 = por %p2132_p1, %p45_p0  ;;  %p2144_p5 = pnand %p1710_p2, %p255_p3 }
   0xc   : > { %s276_s19 = sshll.u32 %s2050_s18, 4  ;;  %s2157_s21 = sadd.s32 1, %s2048_s14   ;;  %s277_s19 = int_to_ptr.vmem [resolvable:$true] %s276_s19 }
   0xd   : > { %s2677_s16 = scalar_select %p2140_p4, 1, 0 }
   0xe   : > { %s2678_s17 = scalar_select %p2144_p5, 1, 0 }
   0xf   : > { %p1811_p6 = pneg %p2144_p5  ;;  %s32_s22 = sadd.s32 1, %s2044_s13 }
  0x10   : > { %s29_s23 = ssub.s32 %s2048_s14, %s2157_s21  ;;  %s1967_s24 = scalar_lea.vmem %s277_s19, 4096 }
  0x11   : > { %p2152_p7 = pnand %p1811_p6, %p2132_p1  ;;  %p1968_p9 = scmp.ne.s32.totalorder %s277_s19, %s1967_s24 }
  0x12   : > { %p1975_p12 = scmp.lt.s32.totalorder %s277_s19, %s277_s19  ;;  %p1976_p13 = scmp.lt.s32.totalorder %s1967_s24, %s1967_s24 }
  0x13   : > { %p1958_p8 = pneg %p2152_p7 }
  0x14   : > { %p1977_p0 = por %p1976_p13, %p1975_p12 }
  0x15   : > { %p1970_p10 = pnand %p1968_p9, %p1958_p8 }
  0x17   : > { %p1971_p11 = pneg %p1970_p10 }
  0x19   : > { %p1978_p2 = pnand %p1977_p0, %p1971_p11 }
  0x1b   : > { %1981 = shalt.err (!%p1978_p2)
}
  0x1c   : > { %s2051_s25 = smov 128   ;;  %s2052_s26 = smov 8  }
  0x1d   : > { %1814 = dma.hbm_to_vmem [thread:$0]  (!%p2152_p7), %s2667_s5, 4096, %s277_s19, [#allocation6], %s2051_s25, %s2051_s25, %s2052_s26  }
  0x1e   : > { %p30_p3 = scmp.eq.s32.totalorder %s29_s23, 0  ;;  %p39_p6 = scmp.ne.s32.totalorder %s2044_s13, %s2040_s12 }
  0x1f   : > { %p40_p8 = scmp.eq.s32.totalorder %s2048_s14, 0  ;;  %p1820_p9 = scmp.lt.s32.totalorder %s2048_s14, 2 }
  0x20   : > { %s2174_s29 = scalar_select %p30_p3, %s2044_s13, %s32_s22  }
  0x21   : > { %p41_p10 = por %p40_p8, %p39_p6  ;;  %s299_s30 = sand.u32 1, %s2044_s13  }
  0x22   : > { %s1803_s10 = smul.u32 304, %s299_s30  ;;  %s2189_s23 = scalar_lea.sflag [#allocation4], %s299_s30 }
  0x23   : > { %s1800_s11 = smul.u32 4864, %s2048_s14  ;;  %p2178_p11 = pnand %p1820_p9, %p41_p10 }
  0x24   : > { %s303_s19 = scalar_lea.vmem [#allocation3], %s1803_s10 }
  0x25   : > { %s2185_s27 = scalar_lea.hbm %s2662_s0, %s1800_s11  ;;  %s311_s22 = sshll.u32 %s303_s19, 4  ;;  %s2187_s22 = int_to_ptr.vmem [resolvable:$true] %s311_s22 }
  0x26   : > { %s1982_s25 = scalar_lea.hbm %s2185_s27, 4864  ;;  %p1984_p12 = pneg %p2178_p11 }
  0x27   : > { %p1983_p7 = scmp.ne.s32.totalorder %s2185_s27, %s1982_s25  ;;  %s1987_s11 = scalar_lea.hbm %s2662_s0, 9728 }
  0x28   : > { %p1988_p2 = scmp.lt.s32.totalorder %s2185_s27, %s2662_s0  ;;  %p1989_p3 = scmp.lt.s32.totalorder %s1987_s11, %s1982_s25 }
  0x29   : > { %p1985_p13 = pnand %p1984_p12, %p1983_p7 }
  0x2a   : > { %p1990_p6 = por %p1989_p3, %p1988_p2 }
  0x2b   : > { %p1986_p0 = pneg %p1985_p13 }
  0x2d   : > { %p1991_p8 = pnand %p1990_p6, %p1986_p0 }
  0x2f   : > { %1994 = shalt.err (!%p1991_p8)
}
  0x30   : > { %s1995_s30 = scalar_lea.vmem %s2187_s22, 4864  ;;  %s2053_s10 = smov [#allocation3]  }
  0x31   : > { %p1996_p9 = scmp.ne.s32.totalorder %s2187_s22, %s1995_s30  ;;  %s2000_s19 = sshll.u32 %s2053_s10, 4  ;;  %s2001_s19 = int_to_ptr.vmem [resolvable:$false] %s2000_s19 }
  0x32   : > { %s2002_s26 = scalar_lea.vmem %s2001_s19, 9728  ;;  %p2003_p13 = scmp.lt.s32.totalorder %s2187_s22, %s2001_s19 }
  0x33   : > { %p1998_p10 = pnand %p1996_p9, %p1984_p12  ;;  %p2004_p1 = scmp.lt.s32.totalorder %s2002_s26, %s1995_s30 }
  0x35   : > { %p1999_p7 = pneg %p1998_p10  ;;  %p2005_p4 = por %p2004_p1, %p2003_p13 }
  0x37   : > { %p2006_p5 = pnand %p2005_p4, %p1999_p7 }
  0x39   : > { %2009 = shalt.err (!%p2006_p5)
}
  0x3a   : > { %s2054_s25 = smov 256   ;;  %s2055_s28 = smov 16  }
  0x3b   : > { %1818 = dma.hbm_to_vmem [thread:$0]  (!%p2178_p11), %s2185_s27, 4864, %s2187_s22, %s2189_s23, %s2054_s25, %s2054_s25, %s2055_s28  }
  0x3c   : > { %p2681_p12 = scmp.ne.s32.totalorder %s2678_s17, 0 }
  0x3d   : > { %s334_s11 = sand.u32 (!%p2681_p12), 1, %s2040_s12   ;;  %p2682_p1 = scmp.ne.s32.totalorder (!%p2681_p12), %s2677_s16, 0 }
  0x3e   : > { %332 = sbr.rel (%p2681_p12) target bundleno = 769 (0x301), region = 56  ;;  %s335_s20 = scalar_lea.sflag (!%p2681_p12), [#allocation4], %s334_s11 }
  0x3f   : > { %s1804_s24 = smul.u32 (!%p2681_p12), 304, %s334_s11 }
  0x41   : > { %s2213_s30 = scalar_lea.vmem (!%p2681_p12), [#allocation3], %s1804_s24 }
  0x43   : > { %2027 = dma.done.wait (%p2682_p1), %s335_s20, 4864  }
  0x44   : > { %2029 = vsyncadd (%p2682_p1), %s335_s20, 4294962432  ;;  %p2683_p4 = scmp.ne.s32.totalorder %s2676_s15, 0 }
  0x46   : > { %2031 = dma.done.wait (%p2683_p4), [#allocation6], 4096  }
  0x47   : > { %2033 = vsyncadd (%p2683_p4), [#allocation6], 4294963200  ;;  %s383_s17 = smul.u32 19, %s1708_s8  ;;  %v2056_v1 = vmov 0   ;;  %vm556_vm0 = vcmask 1041408   ;;  %vm525_vm1 = vcmask 31744  }
  0x48   : > { %675 = vmatprep.mubr.bf16.mxu1 %v2056_v1  ;;  %595 = vmatprep.mubr.bf16.mxu0 %v2056_v1  ;;  %v1719_v2 = vld.sshfl [vmem:[%s2665_s3] sm:$0x33 pattern:$0x76325410]  ;;  %v1862_v7 = vld [vmem:[%s2664_s2 + $0x74] ss:$8 sps:$4 sm:$0xff]  }
  0x49   : > { %p384_p5 = scmp.lt.s32.totalorder %s383_s17, 37  ;;  %v524_v3 = vcombine.high %v1719_v2, %v1719_v2  ;;  %v558_v4 = vsel %vm556_vm0, %v1719_v2, 0  ;;  %v1860_v9 = vld [vmem:[%s2664_s2 + $0x70] ss:$8 sps:$4 sm:$0xff]   ;;  %v1865_v10 = vld [vmem:[%s2664_s2 + $0x64] ss:$8 sps:$4 sm:$0xff]  }
  0x4a   : > { %v1863_v11 = vld [vmem:[%s2664_s2 + $0x60] ss:$8 sps:$4 sm:$0xff]   ;;  %v1868_v12 = vld [vmem:[%s2664_s2 + $0x54] ss:$8 sps:$4 sm:$0xff]   ;;  %v1866_v13 = vld [vmem:[%s2664_s2 + $0x50] ss:$8 sps:$4 sm:$0xff]  }
  0x4b   : > { %s2689_s17 = smov (!%p384_p5, %s383_s17), 37  ;;  %1801 = vmatprep.subr.msk.bf16.mxu1 %vm556_vm0, %v524_v3  ;;  %1720 = vmatprep.subr.msk.bf16.mxu0 %vm556_vm0, %v524_v3  ;;  %v1871_v14 = vld [vmem:[%s2664_s2 + $0x44] ss:$8 sps:$4 sm:$0xff]   ;;  %v1869_v15 = vld [vmem:[%s2664_s2 + $0x40] ss:$8 sps:$4 sm:$0xff]   ;;  %vm1599_vm2 = vcmask 7168  }
  0x4c   : > { %s1717_s16 = sshll.u32 %s2689_s17, 3  ;;  %1802 = vmatpush1.bf16.msra.mxu1 %v558_v4  ;;  %578 = vmatpush1.bf16.msra.mxu0 %v558_v4  ;;  %v1874_v16 = vld [vmem:[%s2664_s2 + $0x34] ss:$8 sps:$4 sm:$0xff]   ;;  %v1872_v19 = vld [vmem:[%s2664_s2 + $0x30] ss:$8 sps:$4 sm:$0xff]  }
  0x4d   : > { %s2238_s8 = scalar_lea.vmem %s2663_s1, %s1717_s16  ;;  %854 = vmatprep.subr.bf16.mxu1 %v1862_v7  ;;  %v1877_v20 = vld [vmem:[%s2664_s2 + $0x24] ss:$8 sps:$4 sm:$0xff]   ;;  %v1875_v26 = vld [vmem:[%s2664_s2 + $0x20] ss:$8 sps:$4 sm:$0xff]   ;;  %v1880_v28 = vld [vmem:[%s2664_s2 + $0x14] ss:$8 sps:$4 sm:$0xff]   ;;  %s2609_s22 = scalar_lea.vmem %s2671_s9, %s1717_s16 }
  0x4e   : > { %v470_v5 = vld [vmem:[%s2238_s8 + $0x80] sm:$0xff]  ;;  %v471_v6 = vld [vmem:[%s2238_s8 + $0x88] sm:$0xff]  ;;  %v472_v17 = vld [vmem:[%s2238_s8 + $0x90] sm:$0xff] }
  0x4f   : > { %v481_v8 = vpack.c.bf16 %v471_v6, %v470_v5  ;;  %v482_v18 = vpack.c.bf16 %v472_v17, %v472_v17  ;;  %v454_v21 = vld [vmem:[%s2238_s8] sm:$0xff]  ;;  %v455_v22 = vld [vmem:[%s2238_s8 + $0x8] sm:$0xff]  ;;  %v456_v29 = vld [vmem:[%s2238_s8 + $0x10] sm:$0xff] }
  0x50   : > { %v473_v23 = vpack.c.bf16 %v455_v22, %v454_v21  ;;  %v397_v24 = vld [vmem:[%s2213_s30 + $0x8] sm:$0xff]  ;;  %v399_v25 = vld [vmem:[%s2213_s30 + $0x18] sm:$0xff]  ;;  %v396_v63 = vld [vmem:[%s2213_s30] sm:$0xff] }
  0x51   : > { %1729 = vmatmul.mubr.msk.bf16.vlgmr.msra.gmra.mxu1 %vm525_vm1, %v481_v8  ;;  %v435_v27 = vpack.c.bf16 %v399_v25, %v397_v24  ;;  %v457_v30 = vld [vmem:[%s2238_s8 + $0x18] sm:$0xff]  ;;  %v1883_v33 = vld [vmem:[%s2664_s2 + $0x4] ss:$8 sps:$4 sm:$0xff]   ;;  %v1881_v34 = vld [vmem:[%s2664_s2] ss:$8 sps:$4 sm:$0xff]  }
  0x52   : > { %855 = vmatpush1.bf16.msra.mxu1 %v1860_v9  ;;  %685 = vmatprep.mubr.bf16.mxu1 %v2056_v1  ;;  %v1878_v31 = vld [vmem:[%s2664_s2 + $0x10] ss:$8 sps:$4 sm:$0xff]   ;;  %v474_v32 = vpack.c.bf16 %v457_v30, %v456_v29  ;;  %v1886_v35 = vld [vmem:[%s2664_s2 + $0xf4] ss:$8 sps:$4 sm:$0xff]   ;;  %v458_v36 = vld [vmem:[%s2238_s8 + $0x20] sm:$0xff] }
  0x53   : > { %856 = vmatprep.subr.bf16.mxu1 %v1865_v10  ;;  %1721 = vmatmul.mubr.msk.bf16.vlgmr.msra.gmra.mxu0 %vm525_vm1, %v473_v23  ;;  %v459_v37 = vld [vmem:[%s2238_s8 + $0x28] sm:$0xff]  ;;  %v1884_v38 = vld [vmem:[%s2664_s2 + $0xf0] ss:$8 sps:$4 sm:$0xff]   ;;  %v1892_v42 = vld [vmem:[%s2664_s2 + $0xd4] ss:$8 sps:$4 sm:$0xff]  }
  0x54   : > { %605 = vmatprep.mubr.bf16.mxu0 %v2056_v1  ;;  %v475_v39 = vpack.c.bf16 %v459_v37, %v458_v36  ;;  %v1889_v40 = vld [vmem:[%s2664_s2 + $0xe4] ss:$8 sps:$4 sm:$0xff]   ;;  %v1887_v41 = vld [vmem:[%s2664_s2 + $0xe0] ss:$8 sps:$4 sm:$0xff]   ;;  %v460_v43 = vld [vmem:[%s2238_s8 + $0x30] sm:$0xff] }
  0x55   : > { %v461_v44 = vld [vmem:[%s2238_s8 + $0x38] sm:$0xff]  ;;  %v1895_v46 = vld [vmem:[%s2664_s2 + $0xc4] ss:$8 sps:$4 sm:$0xff]   ;;  %v1893_v48 = vld [vmem:[%s2664_s2 + $0xc0] ss:$8 sps:$4 sm:$0xff]  }
  0x56   : > { %857 = vmatpush1.bf16.msra.mxu1 %v1863_v11  ;;  %v1890_v45 = vld [vmem:[%s2664_s2 + $0xd0] ss:$8 sps:$4 sm:$0xff]   ;;  %v476_v47 = vpack.c.bf16 %v461_v44, %v460_v43  ;;  %v1898_v49 = vld [vmem:[%s2664_s2 + $0xb4] ss:$8 sps:$4 sm:$0xff]   ;;  %v462_v50 = vld [vmem:[%s2238_s8 + $0x40] sm:$0xff] }
  0x57   : > { %858 = vmatprep.subr.bf16.mxu1 %v1868_v12  ;;  %v463_v51 = vld [vmem:[%s2238_s8 + $0x48] sm:$0xff]  ;;  %v1896_v52 = vld [vmem:[%s2664_s2 + $0xb0] ss:$8 sps:$4 sm:$0xff]   ;;  %v1904_v56 = vld [vmem:[%s2664_s2 + $0x94] ss:$8 sps:$4 sm:$0xff]  }
  0x58   : > { %v477_v53 = vpack.c.bf16 %v463_v51, %v462_v50  ;;  %v1901_v54 = vld [vmem:[%s2664_s2 + $0xa4] ss:$8 sps:$4 sm:$0xff]   ;;  %v1899_v55 = vld [vmem:[%s2664_s2 + $0xa0] ss:$8 sps:$4 sm:$0xff]   ;;  %v464_v57 = vld [vmem:[%s2238_s8 + $0x50] sm:$0xff] }
  0x59   : > { %1730 = vmatmul.mubr.msk.bf16.gmra.mxu1 %vm525_vm1, %v482_v18  ;;  %v465_v58 = vld [vmem:[%s2238_s8 + $0x58] sm:$0xff]  ;;  %v1907_v61 = vld [vmem:[%s2664_s2 + $0x84] ss:$8 sps:$4 sm:$0xff]   ;;  %v1905_v62 = vld [vmem:[%s2664_s2 + $0x80] ss:$8 sps:$4 sm:$0xff]  }
  0x5a   : > { %859 = vmatpush1.bf16.msra.mxu1 %v1866_v13  ;;  %886 = vmatprep.mubr.bf16.mxu1 %v435_v27  ;;  %v1902_v59 = vld [vmem:[%s2664_s2 + $0x90] ss:$8 sps:$4 sm:$0xff]   ;;  %v478_v60 = vpack.c.bf16 %v465_v58, %v464_v57  ;;  %v466_v4 = vld [vmem:[%s2238_s8 + $0x60] sm:$0xff]  ;;  %v467_v5 = vld [vmem:[%s2238_s8 + $0x68] sm:$0xff] }
  0x5b   : > { %860 = vmatprep.subr.bf16.mxu1 %v1871_v14  ;;  %1722 = vmatmul.mubr.msk.bf16.gmra.mxu0 %vm525_vm1, %v474_v32  ;;  %v398_v0 = vld [vmem:[%s2213_s30 + $0x10] sm:$0xff]  ;;  %v401_v2 = vld [vmem:[%s2213_s30 + $0x28] sm:$0xff]  ;;  %v403_v3 = vld [vmem:[%s2213_s30 + $0x38] sm:$0xff]  ;;  %v479_v8 = vpack.c.bf16 %v467_v5, %v466_v4 }
  0x5c   : > { %615 = vmatprep.mubr.bf16.mxu0 %v2056_v1  ;;  %v434_v6 = vpack.c.bf16 %v398_v0, %v396_v63  ;;  %v437_v7 = vpack.c.bf16 %v403_v3, %v401_v2  ;;  %v400_v9 = vld [vmem:[%s2213_s30 + $0x20] sm:$0xff]  ;;  %v402_v10 = vld [vmem:[%s2213_s30 + $0x30] sm:$0xff]  ;;  %v405_v11 = vld [vmem:[%s2213_s30 + $0x48] sm:$0xff] }
  0x5d   : > { %v407_v12 = vld [vmem:[%s2213_s30 + $0x58] sm:$0xff]  ;;  %v404_v21 = vld [vmem:[%s2213_s30 + $0x40] sm:$0xff]  ;;  %v406_v22 = vld [vmem:[%s2213_s30 + $0x50] sm:$0xff] }
  0x5e   : > { %861 = vmatpush1.bf16.msra.mxu1 %v1869_v15  ;;  %v468_v13 = vld [vmem:[%s2238_s8 + $0x70] sm:$0xff]  ;;  %v469_v14 = vld [vmem:[%s2238_s8 + $0x78] sm:$0xff]  ;;  %v436_v15 = vpack.c.bf16 %v402_v10, %v400_v9  ;;  %v1911_v24 = vld [vmem:[#allocation5 + $0x60] ss:$8 sps:$4 sm:$0xff]  }
  0x5f   : > { %862 = vmatprep.subr.bf16.mxu1 %v1874_v16  ;;  %v439_v16 = vpack.c.bf16 %v407_v12, %v405_v11  ;;  %v480_v17 = vpack.c.bf16 %v469_v14, %v468_v13  ;;  %v1908_v18 = vld [vmem:[#allocation5 + $0x70] ss:$8 sps:$4 sm:$0xff]   ;;  %v1916_v25 = vld [vmem:[#allocation5 + $0x54] ss:$8 sps:$4 sm:$0xff]   ;;  %v1919_v29 = vld [vmem:[#allocation5 + $0x44] ss:$8 sps:$4 sm:$0xff]  }
  0x60   : > { %v409_v23 = vld [vmem:[%s2213_s30 + $0x68] sm:$0xff]  ;;  %v408_v30 = vld [vmem:[%s2213_s30 + $0x60] sm:$0xff]  ;;  %v419_v43 = vld [vmem:[%s2213_s30 + $0xb8] sm:$0xff] }
  0x61   : > { %v413_v32 = vld [vmem:[%s2213_s30 + $0x88] sm:$0xff]  ;;  %v416_v50 = vld [vmem:[%s2213_s30 + $0xa0] sm:$0xff]  ;;  %v418_v51 = vld [vmem:[%s2213_s30 + $0xb0] sm:$0xff] }
  0x62   : > { %863 = vmatpush1.bf16.msra.mxu1 %v1872_v19  ;;  %v1910_v19 = vld [vmem:[#allocation5 + $0x74] ss:$8 sps:$4 sm:$0xff]   ;;  %v1923_v44 = vld [vmem:[#allocation5 + $0x20] ss:$8 sps:$4 sm:$0xff]   ;;  %v1932_v58 = vld [vmem:[#allocation5 + $0xf0] ss:$8 sps:$4 sm:$0xff]  }
  0x63   : > { %864 = vmatprep.subr.bf16.mxu1 %v1877_v20  ;;  %1723 = vmatmul.mubr.msk.bf16.gmra.mxu0 %vm525_vm1, %v475_v39  ;;  %v1913_v20 = vld [vmem:[#allocation5 + $0x64] ss:$8 sps:$4 sm:$0xff]   ;;  %v1935_v0 = vld [vmem:[#allocation5 + $0xe0] ss:$8 sps:$4 sm:$0xff]   ;;  %v1940_v2 = vld [vmem:[#allocation5 + $0xd4] ss:$8 sps:$4 sm:$0xff]  }
  0x64   : > { %625 = vmatprep.mubr.bf16.mxu0 %v2056_v1  ;;  %1297 = vmatprep.subr.bf16.mxu0 %v1910_v19  ;;  %v1925_v39 = vld [vmem:[#allocation5 + $0x24] ss:$8 sps:$4 sm:$0xff]   ;;  %v1938_v5 = vld [vmem:[#allocation5 + $0xd0] ss:$8 sps:$4 sm:$0xff]   ;;  %v1941_v11 = vld [vmem:[#allocation5 + $0xc0] ss:$8 sps:$4 sm:$0xff]  }
  0x65   : > { %1298 = vmatpush1.bf16.msra.mxu0 %v1908_v18  ;;  %v427_v63 = vld [vmem:[%s2213_s30 + $0xf8] sm:$0xff]  ;;  %v429_v9 = vld [vmem:[%s2213_s30 + $0x108] sm:$0xff] }
  0x66   : > { %865 = vmatpush1.bf16.msra.mxu1 %v1875_v26  ;;  %1299 = vmatprep.subr.bf16.mxu0 %v1913_v20  ;;  %v438_v26 = vpack.c.bf16 %v406_v22, %v404_v21  ;;  %v431_v10 = vld [vmem:[%s2213_s30 + $0x118] sm:$0xff]  ;;  %v433_v18 = vld [vmem:[%s2213_s30 + $0x128] sm:$0xff]  ;;  %v432_v21 = vld [vmem:[%s2213_s30 + $0x120] sm:$0xff] }
  0x67   : > { %866 = vmatprep.subr.bf16.mxu1 %v1880_v28  ;;  %v1914_v28 = vld [vmem:[#allocation5 + $0x50] ss:$8 sps:$4 sm:$0xff]   ;;  %v1946_v12 = vld [vmem:[#allocation5 + $0xb4] ss:$8 sps:$4 sm:$0xff]   ;;  %v451_v14 = vpack.c.bf16 %v431_v10, %v429_v9  ;;  %v453_v20 = vpack.c.bf16 %v433_v18, %v433_v18  ;;  %v1949_v22 = vld [vmem:[#allocation5 + $0xa4] ss:$8 sps:$4 sm:$0xff]  }
  0x69   : > { %1300 = vmatpush1.bf16.msra.mxu0 %v1911_v24  ;;  %v1952_v24 = vld [vmem:[#allocation5 + $0x94] ss:$8 sps:$4 sm:$0xff]  }
  0x6a   : > { %867 = vmatpush1.bf16.msra.mxu1 %v1878_v31  ;;  %1301 = vmatprep.subr.bf16.mxu0 %v1916_v25  ;;  %v410_v31 = vld [vmem:[%s2213_s30 + $0x70] sm:$0xff] }
  0x6b   : > { %868 = vmatprep.subr.bf16.mxu1 %v1883_v33  ;;  %1724 = vmatmul.mubr.msk.bf16.gmra.mxu0 %vm525_vm1, %v476_v47  ;;  %v415_v33 = vld [vmem:[%s2213_s30 + $0x98] sm:$0xff]  ;;  %v440_v36 = vpack.c.bf16 %v410_v31, %v408_v30 }
  0x6c   : > { %635 = vmatprep.mubr.bf16.mxu0 %v2056_v1  ;;  %v443_v37 = vpack.c.bf16 %v415_v33, %v413_v32  ;;  %v1950_v25 = vld [vmem:[#allocation5 + $0x90] ss:$8 sps:$4 sm:$0xff]  }
  0x6d   : > { %1302 = vmatpush1.bf16.msra.mxu0 %v1914_v28 }
  0x6e   : > { %869 = vmatpush1.bf16.msra.mxu1 %v1881_v34  ;;  %v1917_v34 = vld [vmem:[#allocation5 + $0x40] ss:$8 sps:$4 sm:$0xff]   ;;  %1303 = vmatprep.subr.bf16.mxu0 %v1919_v29 }
  0x6f   : > { %870 = vmatprep.subr.bf16.mxu1 %v1886_v35  ;;  %v1922_v35 = vld [vmem:[#allocation5 + $0x34] ss:$8 sps:$4 sm:$0xff]  }
  0x71   : > { %1304 = vmatpush1.bf16.msra.mxu0 %v1917_v34 }
  0x72   : > { %871 = vmatpush2.bf16.msra.mxu1 %v1884_v38  ;;  %v1920_v38 = vld [vmem:[#allocation5 + $0x30] ss:$8 sps:$4 sm:$0xff]   ;;  %1305 = vmatprep.subr.bf16.mxu0 %v1922_v35 }
  0x73   : > { %872 = vmatprep.subr.bf16.mxu1 %v1889_v40  ;;  %1725 = vmatmul.mubr.msk.bf16.gmra.mxu0 %vm525_vm1, %v477_v53  ;;  %v412_v40 = vld [vmem:[%s2213_s30 + $0x80] sm:$0xff]  ;;  %v423_v53 = vld [vmem:[%s2213_s30 + $0xd8] sm:$0xff] }
  0x74   : > { %645 = vmatprep.mubr.bf16.mxu0 %v2056_v1 }
  0x75   : > { %1306 = vmatpush1.bf16.msra.mxu0 %v1920_v38 }
  0x76   : > { %873 = vmatpush2.bf16.msra.mxu1 %v1887_v41  ;;  %v414_v41 = vld [vmem:[%s2213_s30 + $0x90] sm:$0xff]  ;;  %1307 = vmatprep.subr.bf16.mxu0 %v1925_v39 }
  0x77   : > { %874 = vmatprep.subr.bf16.mxu1 %v1892_v42  ;;  %v417_v42 = vld [vmem:[%s2213_s30 + $0xa8] sm:$0xff] }
  0x78   : > { %v445_v47 = vpack.c.bf16 %v419_v43, %v417_v42 }
  0x79   : > { %1308 = vmatpush1.bf16.msra.mxu0 %v1923_v44 }
  0x7a   : > { %875 = vmatpush2.bf16.msra.mxu1 %v1890_v45  ;;  %v1928_v45 = vld [vmem:[#allocation5 + $0x14] ss:$8 sps:$4 sm:$0xff]  }
  0x7b   : > { %876 = vmatprep.subr.bf16.mxu1 %v1895_v46  ;;  %1726 = vmatmul.mubr.msk.bf16.gmra.mxu0 %vm525_vm1, %v478_v60  ;;  %v442_v46 = vpack.c.bf16 %v414_v41, %v412_v40  ;;  %v420_v60 = vld [vmem:[%s2213_s30 + $0xc0] sm:$0xff] }
  0x7c   : > { %655 = vmatprep.mubr.bf16.mxu0 %v2056_v1  ;;  %1309 = vmatprep.subr.bf16.mxu0 %v1928_v45 }
  0x7e   : > { %877 = vmatpush2.bf16.msra.mxu1 %v1893_v48  ;;  %v1926_v48 = vld [vmem:[#allocation5 + $0x10] ss:$8 sps:$4 sm:$0xff]  }
  0x7f   : > { %878 = vmatprep.subr.bf16.mxu1 %v1898_v49  ;;  %v1931_v49 = vld [vmem:[#allocation5 + $0x4] ss:$8 sps:$4 sm:$0xff]   ;;  %1310 = vmatpush1.bf16.msra.mxu0 %v1926_v48 }
  0x80   : > { %1311 = vmatprep.subr.bf16.mxu0 %v1931_v49 }
  0x82   : > { %879 = vmatpush2.bf16.msra.mxu1 %v1896_v52  ;;  %v421_v52 = vld [vmem:[%s2213_s30 + $0xc8] sm:$0xff] }
  0x83   : > { %880 = vmatprep.subr.bf16.mxu1 %v1901_v54  ;;  %1727 = vmatmul.mubr.msk.bf16.gmra.mxu0 %vm525_vm1, %v479_v8  ;;  %v1929_v54 = vld [vmem:[#allocation5] ss:$8 sps:$4 sm:$0xff]   ;;  %v447_v57 = vpack.c.bf16 %v423_v53, %v421_v52 }
  0x84   : > { %665 = vmatprep.mubr.bf16.mxu0 %v2056_v1  ;;  %v411_v1 = vld [vmem:[%s2213_s30 + $0x78] sm:$0xff]  ;;  %1312 = vmatpush1.bf16.msra.mxu0 %v1929_v54  ;;  %v426_v8 = vld [vmem:[%s2213_s30 + $0xf0] sm:$0xff] }
  0x85   : > { %v441_v27 = vpack.c.bf16 %v411_v1, %v409_v23  ;;  %v1947_v23 = vld [vmem:[#allocation5 + $0xa0] ss:$8 sps:$4 sm:$0xff]   ;;  %v452_v1 = vpack.c.bf16 %v432_v21, %v432_v21 }
  0x86   : > { %881 = vmatpush2.bf16.msra.mxu1 %v1899_v55  ;;  %v1934_v55 = vld [vmem:[#allocation5 + $0xf4] ss:$8 sps:$4 sm:$0xff]  }
  0x87   : > { %882 = vmatprep.subr.bf16.mxu1 %v1904_v56  ;;  %v444_v56 = vpack.c.bf16 %v418_v51, %v416_v50  ;;  %1313 = vmatprep.subr.bf16.mxu0 %v1934_v55  ;;  %v987_v50 = vlaneseq }
  0x88   : > { %1314 = vmatpush2.bf16.msra.mxu0 %v1932_v58 }
  0x89   : > { %v988_v52 = vshrl.u32 %v987_v50, 7 }
  0x8a   : > { %883 = vmatpush2.bf16.msra.mxu1 %v1902_v59  ;;  %v1937_v59 = vld [vmem:[#allocation5 + $0xe4] ss:$8 sps:$4 sm:$0xff]  }
  0x8b   : > { %884 = vmatprep.subr.bf16.mxu1 %v1907_v61  ;;  %1728 = vmatmul.mubr.msk.bf16.gmra.mxu0 %vm525_vm1, %v480_v17  ;;  %v422_v61 = vld [vmem:[%s2213_s30 + $0xd0] sm:$0xff]  ;;  %v2433_v54 = vsub.s32 1, %v988_v52 }
  0x8c   : > { %1315 = vmatprep.subr.bf16.mxu0 %v1937_v59  ;;  %v446_v3 = vpack.c.bf16 %v422_v61, %v420_v60  ;;  %v430_v17 = vld [vmem:[%s2213_s30 + $0x110] sm:$0xff] }
  0x8d   : > { %1316 = vmatpush2.bf16.msra.mxu0 %v1935_v0 }
  0x8e   : > { %885 = vmatpush2.bf16.msra.mxu1 %v1905_v62  ;;  %v425_v62 = vld [vmem:[%s2213_s30 + $0xe8] sm:$0xff]  ;;  %1317 = vmatprep.subr.bf16.mxu0 %v1940_v2 }
  0x8f   : > { %v449_v4 = vpack.c.bf16 %v427_v63, %v425_v62 }
  0x91   : > { %887 = vmatmul.mubr.bf16.vlgmr.msra.gmra.mxu1 %v434_v6  ;;  %v1943_v6 = vld [vmem:[#allocation5 + $0xc4] ss:$8 sps:$4 sm:$0xff]   ;;  %1318 = vmatpush2.bf16.msra.mxu0 %v1938_v5 }
  0x92   : > { %896 = vmatprep.mubr.bf16.mxu1 %v437_v7  ;;  %v424_v7 = vld [vmem:[%s2213_s30 + $0xe0] sm:$0xff]  ;;  %1319 = vmatprep.subr.bf16.mxu0 %v1943_v6 }
  0x93   : > { %v448_v13 = vpack.c.bf16 %v426_v8, %v424_v7 }
  0x95   : > { %1320 = vmatpush2.bf16.msra.mxu0 %v1941_v11 }
  0x96   : > { %1321 = vmatprep.subr.bf16.mxu0 %v1946_v12 }
  0x99   : > { %897 = vmatmul.mubr.bf16.gmra.mxu1 %v436_v15  ;;  %v1944_v15 = vld [vmem:[#allocation5 + $0xb0] ss:$8 sps:$4 sm:$0xff]  }
  0x9a   : > { %906 = vmatprep.mubr.bf16.mxu1 %v439_v16  ;;  %v428_v16 = vld [vmem:[%s2213_s30 + $0x100] sm:$0xff]  ;;  %1322 = vmatpush2.bf16.msra.mxu0 %v1944_v15 }
  0x9b   : > { %v450_v19 = vpack.c.bf16 %v430_v17, %v428_v16  ;;  %1323 = vmatprep.subr.bf16.mxu0 %v1949_v22 }
  0x9e   : > { %1324 = vmatpush2.bf16.msra.mxu0 %v1947_v23 }
  0x9f   : > { %1325 = vmatprep.subr.bf16.mxu0 %v1952_v24 }
  0xa1   : > { %907 = vmatmul.mubr.bf16.gmra.mxu1 %v438_v26  ;;  %v1955_v26 = vld [vmem:[#allocation5 + $0x84] ss:$8 sps:$4 sm:$0xff]  }
  0xa2   : > { %916 = vmatprep.mubr.bf16.mxu1 %v441_v27  ;;  %1326 = vmatpush2.bf16.msra.mxu0 %v1950_v25  ;;  %v1953_v27 = vld [vmem:[#allocation5 + $0x80] ss:$8 sps:$4 sm:$0xff]  }
  0xa3   : > { %1327 = vmatprep.subr.bf16.mxu0 %v1955_v26 }
  0xa6   : > { %1328 = vmatpush2.bf16.msra.mxu0 %v1953_v27 }
  0xa9   : > { %917 = vmatmul.mubr.bf16.gmra.mxu1 %v440_v36 }
  0xaa   : > { %926 = vmatprep.mubr.bf16.mxu1 %v443_v37 }
  0xb1   : > { %927 = vmatmul.mubr.bf16.gmra.mxu1 %v442_v46 }
  0xb2   : > { %936 = vmatprep.mubr.bf16.mxu1 %v445_v47 }
  0xb9   : > { %937 = vmatmul.mubr.bf16.gmra.mxu1 %v444_v56  ;;  %v2435_v56 = vsub.s32 0, %v988_v52 }
  0xba   : > { %946 = vmatprep.mubr.bf16.mxu1 %v447_v57  ;;  %v985_v57 = vld [vmem:[%s2666_s4] sm:$0x3] }
  0xbb   : > { %v2443_v61 = vrot.slane %v985_v57, %v2433_v54  ;;  %v2446_v63 = vrot.slane %v985_v57, %v2435_v56 }
  0xc1   : > { %947 = vmatmul.mubr.bf16.gmra.mxu1 %v446_v3 }
  0xc2   : > { %956 = vmatprep.mubr.bf16.mxu1 %v449_v4 }
  0xc9   : > { %957 = vmatmul.mubr.bf16.gmra.mxu1 %v448_v13 }
  0xca   : > { %966 = vmatprep.mubr.bf16.mxu1 %v451_v14 }
  0xd1   : > { %967 = vmatmul.mubr.bf16.gmra.mxu1 %v450_v19 }
  0xd2   : > { %976 = vmatprep.mubr.bf16.mxu1 %v453_v20 }
  0xd9   : > { %977 = vmatmul.mubr.bf16.gmra.mxu1 %v452_v1 }
 0x111   : > { %v2411_v28 = vpop.f32.mrf.mxu1 }
 0x113   : > { %v2413_v29 = vpop.f32.mrf.mxu1  ;;  %v597_v34 = vpop.f32.mrf.mxu0 }
 0x115   : > { %v2415_v30 = vpop.f32.mrf.mxu1  ;;  %v599_v36 = vpop.f32.mrf.mxu0 }
 0x117   : > { %v2417_v31 = vpop.f32.mrf.mxu1  ;;  %v601_v38 = vpop.f32.mrf.mxu0 }
 0x119   : > { %v2419_v32 = vpop.f32.mrf.mxu1  ;;  %v603_v39 = vpop.f32.mrf.mxu0 }
 0x11b   : > { %v2421_v33 = vpop.f32.mrf.mxu1  ;;  %v607_v40 = vpop.f32.mrf.mxu0 }
 0x11d   : > { %v691_v35 = vpop.f32.mrf.mxu1  ;;  %v609_v41 = vpop.f32.mrf.mxu0 }
 0x11f   : > { %v692_v37 = vpop.f32.mrf.mxu1  ;;  %v611_v42 = vpop.f32.mrf.mxu0 }
 0x121   : > { %v613_v43 = vpop.f32.mrf.mxu0 }
 0x123   : > { %v617_v44 = vpop.f32.mrf.mxu0 }
 0x125   : > { %v619_v45 = vpop.f32.mrf.mxu0 }
 0x127   : > { %v621_v46 = vpop.f32.mrf.mxu0 }
 0x129   : > { %v2423_v47 = vpop.f32.mrf.mxu0 }
 0x12b   : > { %v2425_v48 = vpop.f32.mrf.mxu0 }
 0x12d   : > { %v2427_v49 = vpop.f32.mrf.mxu0 }
 0x12f   : > { %v2429_v51 = vpop.f32.mrf.mxu0 }
 0x131   : > { %v2431_v53 = vpop.f32.mrf.mxu0 }
 0x133   : > { %v2440_v59 = vpop.f32.mrf.mxu0 }
 0x135   : > { %v2448_v4 = vpop.f32.mrf.mxu0 }
 0x137   : > { %v2454_v13 = vpop.f32.mrf.mxu0 }
 0x139   : > { %v2456_v1 = vpop.f32.mrf.mxu0 }
 0x151   : > { %v888_v55 = vpop.f32.mrf.mxu1 }
 0x152   : > { %v889_v62 = vadd.f32 %v888_v55, %v597_v34 }
 0x153   : > { %v890_v58 = vpop.f32.mrf.mxu1 }
 0x154   : > { %v891_v60 = vadd.f32 %v890_v58, %v599_v36  ;;  %v997_v8 = vadd.f32 %v2446_v63, %v889_v62 }
 0x155   : > { %v892_v0 = vpop.f32.mrf.mxu1 }
 0x156   : > { %v893_v2 = vadd.f32 %v892_v0, %v601_v38  ;;  %v998_v5 = vadd.f32 %v2443_v61, %v891_v60  ;;  %v1035_v17 = vmax.f32 %v997_v8, 0.0  ;;  %v2462_v38 = vpop.f32.mrf.mxu0 }
 0x157   : > { %v894_v3 = vpop.f32.mrf.mxu1 }
 0x158   : > { %v999_v6 = vadd.f32 %v2446_v63, %v893_v2  ;;  %v895_v7 = vadd.f32 %v894_v3, %v603_v39  ;;  %v1036_v14 = vmax.f32 %v998_v5, 0.0  ;;  %v649_v60 = vpop.f32.mrf.mxu0 }
 0x159   : > { %v898_v9 = vpop.f32.mrf.mxu1 }
 0x15a   : > { %v1000_v10 = vadd.f32 %v2443_v61, %v895_v7  ;;  %v1037_v11 = vmax.f32 %v999_v6, 0.0  ;;  %v899_v18 = vadd.f32 %v898_v9, %v607_v40 }
 0x15b   : > { %v900_v12 = vpop.f32.mrf.mxu1 }
 0x15c   : > { %v1038_v15 = vmax.f32 %v1000_v10, 0.0  ;;  %v901_v16 = vadd.f32 %v900_v12, %v609_v41  ;;  %v1073_v22 = vpack.c.bf16 %v1037_v11, %v1035_v17  ;;  %v1001_v27 = vadd.f32 %v2446_v63, %v899_v18 }
 0x15d   : > { %v902_v19 = vpop.f32.mrf.mxu1 }
 0x15e   : > { %v903_v20 = vadd.f32 %v902_v19, %v611_v42  ;;  %v1074_v21 = vpack.c.bf16 %v1038_v15, %v1036_v14  ;;  %v1002_v24 = vadd.f32 %v2443_v61, %v901_v16  ;;  %v1039_v42 = vmax.f32 %v1001_v27, 0.0 }
 0x15f   : > { %v904_v23 = vpop.f32.mrf.mxu1 }
 0x160   : > { %v1003_v25 = vadd.f32 %v2446_v63, %v903_v20  ;;  %v905_v26 = vadd.f32 %v904_v23, %v613_v43  ;;  %1329 = vmatprep.mubr.bf16.mxu0 %v1074_v21  ;;  %v1040_v39 = vmax.f32 %v1002_v24, 0.0 }
 0x161   : > { %v908_v34 = vpop.f32.mrf.mxu1  ;;  %1330 = vmatmul.mubr.bf16.vlgmr.msra.gmra.mxu0 %v1073_v22 }
 0x162   : > { %v1004_v35 = vadd.f32 %v2443_v61, %v905_v26  ;;  %v1041_v36 = vmax.f32 %v1003_v25, 0.0  ;;  %v909_v50 = vadd.f32 %v908_v34, %v617_v44 }
 0x163   : > { %v910_v37 = vpop.f32.mrf.mxu1 }
 0x164   : > { %v1042_v40 = vmax.f32 %v1004_v35, 0.0  ;;  %v911_v41 = vadd.f32 %v910_v37, %v619_v45  ;;  %v1075_v58 = vpack.c.bf16 %v1041_v36, %v1039_v42  ;;  %v1005_v3 = vadd.f32 %v2446_v63, %v909_v50 }
 0x165   : > { %v912_v52 = vpop.f32.mrf.mxu1 }
 0x166   : > { %v913_v55 = vadd.f32 %v912_v52, %v621_v46  ;;  %v1076_v57 = vpack.c.bf16 %v1042_v40, %v1040_v39  ;;  %v1006_v62 = vadd.f32 %v2443_v61, %v911_v41  ;;  %v651_v46 = vpop.f32.mrf.mxu0  ;;  %v1043_v10 = vmax.f32 %v1005_v3, 0.0 }
 0x167   : > { %v914_v43 = vpop.f32.mrf.mxu1 }
 0x168   : > { %v1007_v0 = vadd.f32 %v2446_v63, %v913_v55  ;;  %v915_v2 = vadd.f32 %v914_v43, %v2423_v47  ;;  %1339 = vmatprep.mubr.bf16.mxu0 %v1076_v57  ;;  %v1044_v7 = vmax.f32 %v1006_v62, 0.0  ;;  %v653_v17 = vpop.f32.mrf.mxu0 }
 0x169   : > { %v918_v5 = vpop.f32.mrf.mxu1  ;;  %1340 = vmatmul.mubr.bf16.gmra.mxu0 %v1075_v58 }
 0x16a   : > { %v1008_v45 = vadd.f32 %v2443_v61, %v915_v2  ;;  %v1045_v44 = vmax.f32 %v1007_v0, 0.0  ;;  %v919_v11 = vadd.f32 %v918_v5, %v2425_v48 }
 0x16b   : > { %v920_v6 = vpop.f32.mrf.mxu1 }
 0x16c   : > { %v1046_v8 = vmax.f32 %v1008_v45, 0.0  ;;  %v921_v9 = vadd.f32 %v920_v6, %v2427_v49  ;;  %v1077_v16 = vpack.c.bf16 %v1045_v44, %v1043_v10  ;;  %v1009_v21 = vadd.f32 %v2446_v63, %v919_v11 }
 0x16d   : > { %v922_v12 = vpop.f32.mrf.mxu1 }
 0x16e   : > { %v923_v47 = vadd.f32 %v922_v12, %v2429_v51  ;;  %v1078_v14 = vpack.c.bf16 %v1046_v8, %v1044_v7  ;;  %v1010_v18 = vadd.f32 %v2443_v61, %v921_v9  ;;  %v657_v51 = vpop.f32.mrf.mxu0  ;;  %v1047_v27 = vmax.f32 %v1009_v21, 0.0 }
 0x16f   : > { %v924_v15 = vpop.f32.mrf.mxu1 }
 0x170   : > { %v1011_v19 = vadd.f32 %v2446_v63, %v923_v47  ;;  %v925_v20 = vadd.f32 %v924_v15, %v2431_v53  ;;  %1349 = vmatprep.mubr.bf16.mxu0 %v1078_v14  ;;  %v1048_v24 = vmax.f32 %v1010_v18, 0.0  ;;  %v659_v40 = vpop.f32.mrf.mxu0 }
 0x171   : > { %v928_v49 = vpop.f32.mrf.mxu1  ;;  %1350 = vmatmul.mubr.bf16.gmra.mxu0 %v1077_v16 }
 0x172   : > { %v1012_v48 = vadd.f32 %v2443_v61, %v925_v20  ;;  %v1049_v22 = vmax.f32 %v1011_v19, 0.0  ;;  %v929_v34 = vadd.f32 %v928_v49, %v2440_v59 }
 0x173   : > { %v930_v23 = vpop.f32.mrf.mxu1 }
 0x174   : > { %v1050_v25 = vmax.f32 %v1012_v48, 0.0  ;;  %v931_v26 = vadd.f32 %v930_v23, %v2448_v4  ;;  %v1079_v39 = vpack.c.bf16 %v1049_v22, %v1047_v27  ;;  %v1013_v52 = vadd.f32 %v2446_v63, %v929_v34 }
 0x175   : > { %v932_v35 = vpop.f32.mrf.mxu1 }
 0x176   : > { %v933_v53 = vadd.f32 %v932_v35, %v2454_v13  ;;  %v1080_v36 = vpack.c.bf16 %v1050_v25, %v1048_v24  ;;  %v1014_v41 = vadd.f32 %v2443_v61, %v931_v26  ;;  %v661_v13 = vpop.f32.mrf.mxu0  ;;  %v1051_v0 = vmax.f32 %v1013_v52, 0.0 }
 0x177   : > { %v934_v37 = vpop.f32.mrf.mxu1 }
 0x178   : > { %v1015_v42 = vadd.f32 %v2446_v63, %v933_v53  ;;  %v935_v50 = vadd.f32 %v934_v37, %v2456_v1  ;;  %1359 = vmatprep.mubr.bf16.mxu0 %v1080_v36  ;;  %v1052_v43 = vmax.f32 %v1014_v41, 0.0  ;;  %v663_v44 = vpop.f32.mrf.mxu0 }
 0x179   : > { %v938_v4 = vpop.f32.mrf.mxu1  ;;  %1360 = vmatmul.mubr.bf16.gmra.mxu0 %v1079_v39 }
 0x17a   : > { %v1016_v59 = vadd.f32 %v2443_v61, %v935_v50  ;;  %v1053_v55 = vmax.f32 %v1015_v42, 0.0  ;;  %v939_v2 = vadd.f32 %v938_v4, %v2462_v38  ;;  %v667_v38 = vpop.f32.mrf.mxu0 }
 0x17b   : > { %v940_v57 = vpop.f32.mrf.mxu1 }
 0x17c   : > { %v1054_v58 = vmax.f32 %v1016_v59, 0.0  ;;  %v941_v62 = vadd.f32 %v940_v57, %v649_v60  ;;  %v1081_v6 = vpack.c.bf16 %v1053_v55, %v1051_v0  ;;  %v1017_v10 = vadd.f32 %v2446_v63, %v939_v2  ;;  %v669_v49 = vpop.f32.mrf.mxu0 }
 0x17d   : > { %v942_v3 = vpop.f32.mrf.mxu1 }
 0x17e   : > { %v943_v5 = vadd.f32 %v942_v3, %v651_v46  ;;  %v1082_v45 = vpack.c.bf16 %v1054_v58, %v1052_v43  ;;  %v1018_v7 = vadd.f32 %v2443_v61, %v941_v62  ;;  %v1055_v16 = vmax.f32 %v1017_v10, 0.0 }
 0x17f   : > { %v944_v1 = vpop.f32.mrf.mxu1 }
 0x180   : > { %v1019_v8 = vadd.f32 %v2446_v63, %v943_v5  ;;  %v945_v9 = vadd.f32 %v944_v1, %v653_v17  ;;  %1369 = vmatprep.mubr.bf16.mxu0 %v1082_v45  ;;  %v1056_v46 = vmax.f32 %v1018_v7, 0.0 }
 0x181   : > { %v948_v11 = vpop.f32.mrf.mxu1  ;;  %1370 = vmatmul.mubr.bf16.gmra.mxu0 %v1081_v6 }
 0x182   : > { %v1020_v60 = vadd.f32 %v2443_v61, %v945_v9  ;;  %v1057_v12 = vmax.f32 %v1019_v8, 0.0  ;;  %v949_v18 = vadd.f32 %v948_v11, %v657_v51  ;;  %v671_v51 = vpop.f32.mrf.mxu0 }
 0x183   : > { %v950_v47 = vpop.f32.mrf.mxu1 }
 0x184   : > { %v1058_v14 = vmax.f32 %v1020_v60, 0.0  ;;  %v951_v15 = vadd.f32 %v950_v47, %v659_v40  ;;  %v1083_v48 = vpack.c.bf16 %v1057_v12, %v1055_v16  ;;  %v1021_v25 = vadd.f32 %v2446_v63, %v949_v18  ;;  %v673_v52 = vpop.f32.mrf.mxu0 }
 0x185   : > { %v952_v19 = vpop.f32.mrf.mxu1 }
 0x186   : > { %v953_v20 = vadd.f32 %v952_v19, %v661_v13  ;;  %v1084_v21 = vpack.c.bf16 %v1058_v14, %v1056_v46  ;;  %v1022_v22 = vadd.f32 %v2443_v61, %v951_v15  ;;  %v1059_v39 = vmax.f32 %v1021_v25, 0.0  ;;  %v1466_v25 = vld [vmem:[%s2669_s7] sm:$0x3] }
 0x187   : > { %v954_v17 = vpop.f32.mrf.mxu1 }
 0x188   : > { %v1023_v23 = vadd.f32 %v2446_v63, %v953_v20  ;;  %v955_v24 = vadd.f32 %v954_v17, %v663_v44  ;;  %1379 = vmatprep.mubr.bf16.mxu0 %v1084_v21  ;;  %v1060_v53 = vmax.f32 %v1022_v22, 0.0 }
 0x189   : > { %v958_v26 = vpop.f32.mrf.mxu1  ;;  %1380 = vmatmul.mubr.bf16.gmra.mxu0 %v1083_v48 }
 0x18a   : > { %v1024_v27 = vadd.f32 %v2443_v61, %v955_v24  ;;  %v1061_v34 = vmax.f32 %v1023_v23, 0.0  ;;  %v959_v40 = vadd.f32 %v958_v26, %v667_v38 }
 0x18b   : > { %v960_v35 = vpop.f32.mrf.mxu1 }
 0x18c   : > { %v1062_v36 = vmax.f32 %v1024_v27, 0.0  ;;  %v961_v37 = vadd.f32 %v960_v35, %v669_v49  ;;  %v1085_v59 = vpack.c.bf16 %v1061_v34, %v1059_v39  ;;  %v1025_v43 = vadd.f32 %v2446_v63, %v959_v40 }
 0x18d   : > { %v962_v41 = vpop.f32.mrf.mxu1  ;;  %v2525_v35 = vrot.slane %v1466_v25, %v2435_v56 }
 0x18e   : > { %v963_v42 = vadd.f32 %v962_v41, %v671_v51  ;;  %v1086_v50 = vpack.c.bf16 %v1062_v36, %v1060_v53  ;;  %v1026_v55 = vadd.f32 %v2443_v61, %v961_v37  ;;  %v1063_v1 = vmax.f32 %v1025_v43, 0.0 }
 0x18f   : > { %v964_v4 = vpop.f32.mrf.mxu1  ;;  %v2528_v53 = vrot.slane %v1466_v25, %v2433_v54 }
 0x190   : > { %v1027_v57 = vadd.f32 %v2446_v63, %v963_v42  ;;  %v965_v13 = vadd.f32 %v964_v4, %v673_v52  ;;  %1389 = vmatprep.mubr.bf16.mxu0 %v1086_v50  ;;  %v1064_v3 = vmax.f32 %v1026_v55, 0.0 }
 0x191   : > { %v968_v58 = vpop.f32.mrf.mxu1  ;;  %1390 = vmatmul.mubr.bf16.gmra.mxu0 %v1085_v59 }
 0x192   : > { %v1028_v62 = vadd.f32 %v2443_v61, %v965_v13  ;;  %v1065_v0 = vmax.f32 %v1027_v57, 0.0  ;;  %v969_v44 = vadd.f32 %v968_v58, %v2411_v28 }
 0x193   : > { %v970_v2 = vpop.f32.mrf.mxu1 }
 0x194   : > { %v1066_v5 = vmax.f32 %v1028_v62, 0.0  ;;  %v971_v45 = vadd.f32 %v970_v2, %v2413_v29  ;;  %v1087_v10 = vpack.c.bf16 %v1065_v0, %v1063_v1  ;;  %v1029_v38 = vadd.f32 %v2446_v63, %v969_v44 }
 0x195   : > { %v972_v6 = vpop.f32.mrf.mxu1 }
 0x196   : > { %v973_v7 = vadd.f32 %v972_v6, %v2415_v30  ;;  %v1088_v8 = vpack.c.bf16 %v1066_v5, %v1064_v3  ;;  %v1030_v11 = vadd.f32 %v2443_v61, %v971_v45  ;;  %v1067_v18 = vmax.f32 %v1029_v38, 0.0 }
 0x197   : > { %v974_v9 = vpop.f32.mrf.mxu1 }
 0x198   : > { %v1031_v60 = vadd.f32 %v2446_v63, %v973_v7  ;;  %v975_v12 = vadd.f32 %v974_v9, %v2417_v31  ;;  %1399 = vmatprep.mubr.bf16.mxu0 %v1088_v8  ;;  %v1068_v14 = vmax.f32 %v1030_v11, 0.0 }
 0x199   : > { %v978_v47 = vpop.f32.mrf.mxu1  ;;  %1400 = vmatmul.mubr.bf16.gmra.mxu0 %v1087_v10 }
 0x19a   : > { %v1032_v29 = vadd.f32 %v2443_v61, %v975_v12  ;;  %v1069_v28 = vmax.f32 %v1031_v60, 0.0  ;;  %v979_v46 = vadd.f32 %v978_v47, %v2419_v32 }
 0x19b   : > { %v980_v30 = vpop.f32.mrf.mxu1 }
 0x19c   : > { %v1070_v15 = vmax.f32 %v1032_v29, 0.0  ;;  %v981_v16 = vadd.f32 %v980_v30, %v2421_v33  ;;  %v1033_v21 = vadd.f32 %v2446_v63, %v979_v46  ;;  %v1089_v17 = vpack.c.bf16 %v1069_v28, %v1067_v18  ;;  %v1125_v33 = vld [vmem:[%s2668_s6] sm:$0x3] }
 0x19d   : > { %v982_v19 = vpop.f32.mrf.mxu1  ;;  %v2514_v24 = vrot.slane %v1125_v33, %v2435_v56 }
 0x19e   : > { %v1034_v20 = vadd.f32 %v2443_v61, %v981_v16  ;;  %v1090_v31 = vpack.c.bf16 %v1070_v15, %v1068_v14  ;;  %v1071_v23 = vmax.f32 %v1033_v21, 0.0  ;;  %v2517_v61 = vrot.slane %v1125_v33, %v2433_v54 }
 0x19f   : > { %v983_v49 = vpop.f32.mrf.mxu1 }
 0x1a0   : > { %v1072_v48 = vmax.f32 %v1034_v20, 0.0  ;;  %1409 = vmatprep.mubr.bf16.mxu0 %v1090_v31  ;;  %v1091_v32 = vpack.c.bf16 %v1071_v23, %v1071_v23 }
 0x1a1   : > { %1410 = vmatmul.mubr.bf16.gmra.mxu0 %v1089_v17 }
 0x1a2   : > { %v1092_v22 = vpack.c.bf16 %v1072_v48, %v1072_v48 }
 0x1a4   : > { %1419 = vmatprep.mubr.bf16.mxu0 %v1092_v22 }
 0x1a9   : > { %1420 = vmatmul.mubr.bf16.gmra.mxu0 %v1091_v32 }
 0x221   : > { %v1331_v63 = vpop.f32.mrf.mxu0 }
 0x222   : > { %v1332_v26 = vadd.f32 %v1331_v63, %v2514_v24 }
 0x223   : > { %v1333_v27 = vpop.f32.mrf.mxu0 }
 0x224   : > { %v1428_v34 = vmax.f32 %v1332_v26, 0.0  ;;  %v1334_v51 = vadd.f32 %v1333_v27, %v2517_v61 }
 0x225   : > { %v1335_v36 = vpop.f32.mrf.mxu0 }
 0x226   : > { %v1429_v37 = vmax.f32 %v1334_v51, 0.0  ;;  %v1336_v39 = vadd.f32 %v1335_v36, %v2514_v24  ;;  %v1478_v50 = vmul.f32 %v2525_v35, %v1428_v34 }
 0x227   : > { %v1337_v40 = vpop.f32.mrf.mxu0 }
 0x228   : > { %v1430_v41 = vmax.f32 %v1336_v39, 0.0  ;;  %v1338_v42 = vadd.f32 %v1337_v40, %v2517_v61  ;;  %v1479_v52 = vmul.f32 %v2528_v53, %v1429_v37 }
 0x229   : > { %v1341_v4 = vpop.f32.mrf.mxu0 }
 0x22a   : > { %v1431_v59 = vmax.f32 %v1338_v42, 0.0  ;;  %v1342_v56 = vadd.f32 %v1341_v4, %v2514_v24  ;;  %v1516_v55 = vadd.f32 %v1479_v52, %v1478_v50  ;;  %v1480_v54 = vmul.f32 %v2525_v35, %v1430_v41 }
 0x22b   : > { %v1343_v57 = vpop.f32.mrf.mxu0 }
 0x22c   : > { %v1481_v13 = vmul.f32 %v2528_v53, %v1431_v59  ;;  %v1432_v43 = vmax.f32 %v1342_v56, 0.0  ;;  %v1344_v58 = vadd.f32 %v1343_v57, %v2517_v61  ;;  %1517 = vadd.xlane.f32.xlu0 %v1516_v55 }
 0x22d   : > { %v1345_v62 = vpop.f32.mrf.mxu0 }
 0x22e   : > { %v1433_v0 = vmax.f32 %v1344_v58, 0.0  ;;  %v1346_v2 = vadd.f32 %v1345_v62, %v2514_v24  ;;  %v1519_v3 = vadd.f32 %v1481_v13, %v1480_v54  ;;  %v1482_v44 = vmul.f32 %v2525_v35, %v1432_v43 }
 0x22f   : > { %v1347_v5 = vpop.f32.mrf.mxu0 }
 0x230   : > { %v1434_v45 = vmax.f32 %v1346_v2, 0.0  ;;  %v1348_v1 = vadd.f32 %v1347_v5, %v2517_v61  ;;  %1520 = vadd.xlane.f32.xlu0 %v1519_v3  ;;  %v1483_v6 = vmul.f32 %v2528_v53, %v1433_v0 }
 0x231   : > { %v1351_v7 = vpop.f32.mrf.mxu0 }
 0x232   : > { %v1435_v8 = vmax.f32 %v1348_v1, 0.0  ;;  %v1352_v9 = vadd.f32 %v1351_v7, %v2514_v24  ;;  %v1522_v10 = vadd.f32 %v1483_v6, %v1482_v44  ;;  %v1484_v60 = vmul.f32 %v2525_v35, %v1434_v45 }
 0x233   : > { %v1353_v11 = vpop.f32.mrf.mxu0 }
 0x234   : > { %v1485_v12 = vmul.f32 %v2528_v53, %v1435_v8  ;;  %v1436_v38 = vmax.f32 %v1352_v9, 0.0  ;;  %v1354_v47 = vadd.f32 %v1353_v11, %v2517_v61  ;;  %1523 = vadd.xlane.f32.xlu1 %v1522_v10 }
 0x235   : > { %v1355_v29 = vpop.f32.mrf.mxu0 }
 0x236   : > { %v1437_v28 = vmax.f32 %v1354_v47, 0.0  ;;  %v1356_v46 = vadd.f32 %v1355_v29, %v2514_v24  ;;  %v1525_v30 = vadd.f32 %v1485_v12, %v1484_v60  ;;  %v1486_v15 = vmul.f32 %v2525_v35, %v1436_v38 }
 0x237   : > { %v1357_v14 = vpop.f32.mrf.mxu0 }
 0x238   : > { %v1487_v16 = vmul.f32 %v2528_v53, %v1437_v28  ;;  %v1438_v18 = vmax.f32 %v1356_v46, 0.0  ;;  %v1358_v19 = vadd.f32 %v1357_v14, %v2517_v61  ;;  %1526 = vadd.xlane.f32.xlu1 %v1525_v30 }
 0x239   : > { %v1361_v20 = vpop.f32.mrf.mxu0 }
 0x23a   : > { %v1439_v31 = vmax.f32 %v1358_v19, 0.0  ;;  %v1362_v21 = vadd.f32 %v1361_v20, %v2514_v24  ;;  %v1528_v49 = vadd.f32 %v1487_v16, %v1486_v15  ;;  %v1488_v48 = vmul.f32 %v2525_v35, %v1438_v18 }
 0x23b   : > { %v1363_v17 = vpop.f32.mrf.mxu0 }
 0x23c   : > { %v1489_v22 = vmul.f32 %v2528_v53, %v1439_v31  ;;  %v1440_v23 = vmax.f32 %v1362_v21, 0.0  ;;  %v1364_v32 = vadd.f32 %v1363_v17, %v2517_v61  ;;  %1529 = vadd.xlane.f32.xlu0 %v1528_v49 }
 0x23d   : > { %v1365_v33 = vpop.f32.mrf.mxu0 }
 0x23e   : > { %v1441_v63 = vmax.f32 %v1364_v32, 0.0  ;;  %v1366_v25 = vadd.f32 %v1365_v33, %v2514_v24  ;;  %v1531_v26 = vadd.f32 %v1489_v22, %v1488_v48  ;;  %v1490_v34 = vmul.f32 %v2525_v35, %v1440_v23 }
 0x23f   : > { %v1367_v27 = vpop.f32.mrf.mxu0 }
 0x240   : > { %v1491_v51 = vmul.f32 %v2528_v53, %v1441_v63  ;;  %v1442_v36 = vmax.f32 %v1366_v25, 0.0  ;;  %v1368_v37 = vadd.f32 %v1367_v27, %v2517_v61  ;;  %1532 = vadd.xlane.f32.xlu1 %v1531_v26 }
 0x241   : > { %v1371_v39 = vpop.f32.mrf.mxu0 }
 0x242   : > { %v1443_v40 = vmax.f32 %v1368_v37, 0.0  ;;  %v1372_v41 = vadd.f32 %v1371_v39, %v2514_v24  ;;  %v1534_v42 = vadd.f32 %v1491_v51, %v1490_v34  ;;  %v1492_v52 = vmul.f32 %v2525_v35, %v1442_v36 }
 0x243   : > { %v1373_v50 = vpop.f32.mrf.mxu0 }
 0x244   : > { %v1493_v4 = vmul.f32 %v2528_v53, %v1443_v40  ;;  %v1444_v59 = vmax.f32 %v1372_v41, 0.0  ;;  %v1374_v56 = vadd.f32 %v1373_v50, %v2517_v61  ;;  %1535 = vadd.xlane.f32.xlu0 %v1534_v42 }
 0x245   : > { %v1375_v55 = vpop.f32.mrf.mxu0 }
 0x246   : > { %v1445_v57 = vmax.f32 %v1374_v56, 0.0  ;;  %v1376_v54 = vadd.f32 %v1375_v55, %v2514_v24  ;;  %v1537_v13 = vadd.f32 %v1493_v4, %v1492_v52  ;;  %v1494_v58 = vmul.f32 %v2525_v35, %v1444_v59 }
 0x247   : > { %v1377_v43 = vpop.f32.mrf.mxu0 }
 0x248   : > { %v1495_v62 = vmul.f32 %v2528_v53, %v1445_v57  ;;  %v1446_v0 = vmax.f32 %v1376_v54, 0.0  ;;  %v1378_v2 = vadd.f32 %v1377_v43, %v2517_v61  ;;  %1538 = vadd.xlane.f32.xlu1 %v1537_v13 }
 0x249   : > { %v1381_v3 = vpop.f32.mrf.mxu0 }
 0x24a   : > { %v1447_v5 = vmax.f32 %v1378_v2, 0.0  ;;  %v1382_v45 = vadd.f32 %v1381_v3, %v2514_v24  ;;  %v1540_v1 = vadd.f32 %v1495_v62, %v1494_v58  ;;  %v1496_v6 = vmul.f32 %v2525_v35, %v1446_v0 }
 0x24b   : > { %v1383_v44 = vpop.f32.mrf.mxu0 }
 0x24c   : > { %v1497_v7 = vmul.f32 %v2528_v53, %v1447_v5  ;;  %v1448_v8 = vmax.f32 %v1382_v45, 0.0  ;;  %v1384_v9 = vadd.f32 %v1383_v44, %v2517_v61  ;;  %1541 = vadd.xlane.f32.xlu0 %v1540_v1 }
 0x24d   : > { %v1385_v10 = vpop.f32.mrf.mxu0 }
 0x24e   : > { %v1449_v11 = vmax.f32 %v1384_v9, 0.0  ;;  %v1386_v60 = vadd.f32 %v1385_v10, %v2514_v24  ;;  %v1543_v12 = vadd.f32 %v1497_v7, %v1496_v6  ;;  %v1498_v47 = vmul.f32 %v2525_v35, %v1448_v8 }
 0x24f   : > { %v1387_v38 = vpop.f32.mrf.mxu0 }
 0x250   : > { %v1499_v29 = vmul.f32 %v2528_v53, %v1449_v11  ;;  %v1450_v28 = vmax.f32 %v1386_v60, 0.0  ;;  %v1388_v46 = vadd.f32 %v1387_v38, %v2517_v61  ;;  %1544 = vadd.xlane.f32.xlu1 %v1543_v12 }
 0x251   : > { %v1391_v30 = vpop.f32.mrf.mxu0 }
 0x252   : > { %v1451_v14 = vmax.f32 %v1388_v46, 0.0  ;;  %v1392_v15 = vadd.f32 %v1391_v30, %v2514_v24  ;;  %v1546_v16 = vadd.f32 %v1499_v29, %v1498_v47  ;;  %v1500_v19 = vmul.f32 %v2525_v35, %v1450_v28 }
 0x253   : > { %v1393_v18 = vpop.f32.mrf.mxu0 }
 0x254   : > { %v1501_v20 = vmul.f32 %v2528_v53, %v1451_v14  ;;  %v1452_v31 = vmax.f32 %v1392_v15, 0.0  ;;  %v1394_v21 = vadd.f32 %v1393_v18, %v2517_v61  ;;  %1547 = vadd.xlane.f32.xlu0 %v1546_v16 }
 0x255   : > { %v1395_v49 = vpop.f32.mrf.mxu0 }
 0x256   : > { %v1453_v17 = vmax.f32 %v1394_v21, 0.0  ;;  %v1396_v48 = vadd.f32 %v1395_v49, %v2514_v24  ;;  %v1549_v22 = vadd.f32 %v1501_v20, %v1500_v19  ;;  %v1502_v32 = vmul.f32 %v2525_v35, %v1452_v31  ;;  %v1795_v49 = vld [vmem:[#allocation2] ss:$0 sm:$0xff] }
 0x257   : > { %v1397_v23 = vpop.f32.mrf.mxu0 }
 0x258   : > { %v1503_v33 = vmul.f32 %v2528_v53, %v1453_v17  ;;  %v1454_v63 = vmax.f32 %v1396_v48, 0.0  ;;  %v1398_v25 = vadd.f32 %v1397_v23, %v2517_v61  ;;  %1550 = vadd.xlane.f32.xlu1 %v1549_v22 }
 0x259   : > { %v1401_v26 = vpop.f32.mrf.mxu0 }
 0x25a   : > { %v1455_v27 = vmax.f32 %v1398_v25, 0.0  ;;  %v1402_v34 = vadd.f32 %v1401_v26, %v2514_v24  ;;  %v1552_v51 = vadd.f32 %v1503_v33, %v1502_v32  ;;  %v1504_v37 = vmul.f32 %v2525_v35, %v1454_v63 }
 0x25b   : > { %v1403_v36 = vpop.f32.mrf.mxu0 }
 0x25c   : > { %v1505_v39 = vmul.f32 %v2528_v53, %v1455_v27  ;;  %v1456_v40 = vmax.f32 %v1402_v34, 0.0  ;;  %v1404_v41 = vadd.f32 %v1403_v36, %v2517_v61  ;;  %1553 = vadd.xlane.f32.xlu0 %v1552_v51 }
 0x25d   : > { %v1405_v42 = vpop.f32.mrf.mxu0 }
 0x25e   : > { %v1457_v50 = vmax.f32 %v1404_v41, 0.0  ;;  %v1406_v52 = vadd.f32 %v1405_v42, %v2514_v24  ;;  %v1555_v4 = vadd.f32 %v1505_v39, %v1504_v37  ;;  %v1506_v56 = vmul.f32 %v2525_v35, %v1456_v40 }
 0x25f   : > { %v1407_v59 = vpop.f32.mrf.mxu0 }
 0x260   : > { %v1507_v55 = vmul.f32 %v2528_v53, %v1457_v50  ;;  %v1458_v57 = vmax.f32 %v1406_v52, 0.0  ;;  %v1408_v54 = vadd.f32 %v1407_v59, %v2517_v61  ;;  %1556 = vadd.xlane.f32.xlu1 %v1555_v4 }
 0x261   : > { %v1411_v13 = vpop.f32.mrf.mxu0 }
 0x262   : > { %v1459_v43 = vmax.f32 %v1408_v54, 0.0  ;;  %v1412_v58 = vadd.f32 %v1411_v13, %v2514_v24  ;;  %v1558_v62 = vadd.f32 %v1507_v55, %v1506_v56  ;;  %v1508_v2 = vmul.f32 %v2525_v35, %v1458_v57 }
 0x263   : > { %v1413_v0 = vpop.f32.mrf.mxu0 }
 0x264   : > { %v1509_v3 = vmul.f32 %v2528_v53, %v1459_v43  ;;  %v1460_v5 = vmax.f32 %v1412_v58, 0.0  ;;  %v1414_v45 = vadd.f32 %v1413_v0, %v2517_v61  ;;  %1559 = vadd.xlane.f32.xlu0 %v1558_v62 }
 0x265   : > { %v1415_v1 = vpop.f32.mrf.mxu0 }
 0x266   : > { %v1461_v44 = vmax.f32 %v1414_v45, 0.0  ;;  %v1416_v6 = vadd.f32 %v1415_v1, %v2514_v24  ;;  %v1561_v7 = vadd.f32 %v1509_v3, %v1508_v2  ;;  %v1510_v9 = vmul.f32 %v2525_v35, %v1460_v5 }
 0x267   : > { %v1417_v8 = vpop.f32.mrf.mxu0 }
 0x268   : > { %v1511_v10 = vmul.f32 %v2528_v53, %v1461_v44  ;;  %v1462_v11 = vmax.f32 %v1416_v6, 0.0  ;;  %v1418_v60 = vadd.f32 %v1417_v8, %v2517_v61  ;;  %1562 = vadd.xlane.f32.xlu1 %v1561_v7 }
 0x269   : > { %v1421_v12 = vpop.f32.mrf.mxu0 }
 0x26a   : > { %v1463_v38 = vmax.f32 %v1418_v60, 0.0  ;;  %v1422_v47 = vadd.f32 %v1421_v12, %v2514_v24  ;;  %v1564_v29 = vadd.f32 %v1511_v10, %v1510_v9  ;;  %v1512_v46 = vmul.f32 %v2525_v35, %v1462_v11 }
 0x26b   : > { %v1423_v28 = vpop.f32.mrf.mxu0 }
 0x26c   : > { %v1513_v30 = vmul.f32 %v2528_v53, %v1463_v38  ;;  %v1464_v14 = vmax.f32 %v1422_v47, 0.0  ;;  %v1424_v15 = vadd.f32 %v1423_v28, %v2517_v61  ;;  %1565 = vadd.xlane.f32.xlu0 %v1564_v29 }
 0x26d   : > { %v1425_v16 = vpop.f32.mrf.mxu0 }
 0x26e   : > { %v1465_v18 = vmax.f32 %v1424_v15, 0.0  ;;  %v1567_v19 = vadd.f32 %v1513_v30, %v1512_v46  ;;  %v1514_v31 = vmul.f32 %v2525_v35, %v1464_v14 }
 0x26f   : > { %v1426_v20 = vpop.f32.mrf.mxu0 }
 0x270   : > { %v1515_v21 = vmul.f32 %v2528_v53, %v1465_v18  ;;  %1568 = vadd.xlane.f32.xlu1 %v1567_v19 }
 0x272   : > { %v1570_v24 = vadd.f32 %v1515_v21, %v1514_v31 }
 0x274   : > { %1571 = vadd.xlane.f32.xlu0 %v1570_v24 }
 0x2b5   : > { %v1518_v61 = vpop.xlane.xlu0 %1517 }
 0x2b6   : > { %v1580_v35 = vadd.f32 %v1795_v49, %v1518_v61 }
 0x2b8   : > { %1600 = vst.msk [vmem:[%s2609_s22] sm:$0xff] %vm1599_vm2, %v1580_v35 }
 0x2b9   : > { %v1521_v53 = vpop.xlane.xlu0 %1520 }
 0x2ba   : > { %v1581_v17 = vadd.f32 %v1795_v49, %v1521_v53 }
 0x2bc   : > { %1601 = vst.msk [vmem:[%s2609_s22 + $0x8] sm:$0xff] %vm1599_vm2, %v1581_v17 }
 0x2bd   : > { %v1524_v48 = vpop.xlane.xlu1 %1523 }
 0x2be   : > { %v1582_v22 = vadd.f32 %v1795_v49, %v1524_v48 }
 0x2c0   : > { %1602 = vst.msk [vmem:[%s2609_s22 + $0x10] sm:$0xff] %vm1599_vm2, %v1582_v22 }
 0x2c1   : > { %v1527_v23 = vpop.xlane.xlu1 %1526 }
 0x2c2   : > { %v1583_v32 = vadd.f32 %v1795_v49, %v1527_v23 }
 0x2c4   : > { %1603 = vst.msk [vmem:[%s2609_s22 + $0x18] sm:$0xff] %vm1599_vm2, %v1583_v32 }
 0x2c5   : > { %v1530_v33 = vpop.xlane.xlu0 %1529 }
 0x2c6   : > { %v1584_v63 = vadd.f32 %v1795_v49, %v1530_v33 }
 0x2c8   : > { %1604 = vst.msk [vmem:[%s2609_s22 + $0x20] sm:$0xff] %vm1599_vm2, %v1584_v63 }
 0x2c9   : > { %v1533_v25 = vpop.xlane.xlu1 %1532 }
 0x2ca   : > { %v1585_v26 = vadd.f32 %v1795_v49, %v1533_v25 }
 0x2cc   : > { %1605 = vst.msk [vmem:[%s2609_s22 + $0x28] sm:$0xff] %vm1599_vm2, %v1585_v26 }
 0x2cd   : > { %v1536_v27 = vpop.xlane.xlu0 %1535 }
 0x2ce   : > { %v1586_v34 = vadd.f32 %v1795_v49, %v1536_v27 }
 0x2d0   : > { %1606 = vst.msk [vmem:[%s2609_s22 + $0x30] sm:$0xff] %vm1599_vm2, %v1586_v34 }
 0x2d1   : > { %v1539_v51 = vpop.xlane.xlu1 %1538 }
 0x2d2   : > { %v1587_v36 = vadd.f32 %v1795_v49, %v1539_v51 }
 0x2d4   : > { %1607 = vst.msk [vmem:[%s2609_s22 + $0x38] sm:$0xff] %vm1599_vm2, %v1587_v36 }
 0x2d5   : > { %v1542_v37 = vpop.xlane.xlu0 %1541 }
 0x2d6   : > { %v1588_v39 = vadd.f32 %v1795_v49, %v1542_v37 }
 0x2d8   : > { %1608 = vst.msk [vmem:[%s2609_s22 + $0x40] sm:$0xff] %vm1599_vm2, %v1588_v39 }
 0x2d9   : > { %v1545_v40 = vpop.xlane.xlu1 %1544 }
 0x2da   : > { %v1589_v41 = vadd.f32 %v1795_v49, %v1545_v40 }
 0x2dc   : > { %1609 = vst.msk [vmem:[%s2609_s22 + $0x48] sm:$0xff] %vm1599_vm2, %v1589_v41 }
 0x2dd   : > { %v1548_v42 = vpop.xlane.xlu0 %1547 }
 0x2de   : > { %v1590_v50 = vadd.f32 %v1795_v49, %v1548_v42 }
 0x2e0   : > { %1610 = vst.msk [vmem:[%s2609_s22 + $0x50] sm:$0xff] %vm1599_vm2, %v1590_v50 }
 0x2e1   : > { %v1551_v52 = vpop.xlane.xlu1 %1550 }
 0x2e2   : > { %v1591_v4 = vadd.f32 %v1795_v49, %v1551_v52 }
 0x2e4   : > { %1611 = vst.msk [vmem:[%s2609_s22 + $0x58] sm:$0xff] %vm1599_vm2, %v1591_v4 }
 0x2e5   : > { %v1554_v59 = vpop.xlane.xlu0 %1553 }
 0x2e6   : > { %v1592_v56 = vadd.f32 %v1795_v49, %v1554_v59 }
 0x2e8   : > { %1612 = vst.msk [vmem:[%s2609_s22 + $0x60] sm:$0xff] %vm1599_vm2, %v1592_v56 }
 0x2e9   : > { %v1557_v55 = vpop.xlane.xlu1 %1556 }
 0x2ea   : > { %v1593_v57 = vadd.f32 %v1795_v49, %v1557_v55 }
 0x2ec   : > { %1613 = vst.msk [vmem:[%s2609_s22 + $0x68] sm:$0xff] %vm1599_vm2, %v1593_v57 }
 0x2ed   : > { %v1560_v54 = vpop.xlane.xlu0 %1559 }
 0x2ee   : > { %v1594_v13 = vadd.f32 %v1795_v49, %v1560_v54 }
 0x2f0   : > { %1614 = vst.msk [vmem:[%s2609_s22 + $0x70] sm:$0xff] %vm1599_vm2, %v1594_v13 }
 0x2f1   : > { %v1563_v43 = vpop.xlane.xlu1 %1562 }
 0x2f2   : > { %v1595_v58 = vadd.f32 %v1795_v49, %v1563_v43 }
 0x2f4   : > { %1615 = vst.msk [vmem:[%s2609_s22 + $0x78] sm:$0xff] %vm1599_vm2, %v1595_v58 }
 0x2f5   : > { %v1566_v62 = vpop.xlane.xlu0 %1565 }
 0x2f6   : > { %v1596_v0 = vadd.f32 %v1795_v49, %v1566_v62 }
 0x2f8   : > { %1616 = vst.msk [vmem:[%s2609_s22 + $0x80] sm:$0xff] %vm1599_vm2, %v1596_v0 }
 0x2f9   : > { %v1569_v2 = vpop.xlane.xlu1 %1568 }
 0x2fa   : > { %v1597_v3 = vadd.f32 %v1795_v49, %v1569_v2 }
 0x2fc   : > { %1617 = vst.msk [vmem:[%s2609_s22 + $0x88] sm:$0xff] %vm1599_vm2, %v1597_v3 }
 0x2fd   : > { %v1572_v5 = vpop.xlane.xlu0 %1571 }
 0x2fe   : > { %v1598_v45 = vadd.f32 %v1795_v49, %v1572_v5 }
 0x300   : > { %1618 = vst.msk [vmem:[%s2609_s22 + $0x90] sm:$0xff] %vm1599_vm2, %v1598_v45 }
 0x301 PF: > { %p22_p11 = scmp.ge.s32.totalorder %s2157_s21, 4   ;;  %s2684_s11 = smov %s2040_s12 }
 0x302   : > { %s2685_s12 = smov %s2044_s13  ;;  %s2686_s13 = smov %s2174_s29 }
 0x303   : > { %s2687_s14 = smov %s2157_s21  ;;  %24 = sbr.rel (!%p22_p11) target bundleno = 7 (0x7), region = 103 }
 0x308   :  { %1641 = vsyncpa [#allocation4], 1 }
 0x309   :  { %1643 = vsyncpa [#allocation4 + $0x1], 1 }
 0x30a   :  { %1644 = vsyncpa [#allocation6], 1 }

</bundles_post_ra>
